<compile_context>
chip_gen: v6e
topology: v6e:2x2x1
jax: 0.10.0
libtpu: 0.0.40
codegen_flags: <defaults>
</compile_context>

<pallas_src>
import functools

import jax
import jax.numpy as jnp
from jax.experimental import pallas as pl
from jax.experimental.pallas import tpu as pltpu


def _pvw_kernel(x_ref, w1_ref, w2_ref, b2_ref, o_ref, m_s, s_s, *, Wp, G, Gp, dt):
    # x_ref : (1, dt, G, Cpad) bf16  zero-padded, lane-flattened image for dt depths
    # w1_ref: (16, 9*Gp) bf16        3x3 conv weight, columns ordered (ky, kx, g), g padded
    # w2_ref: (16, 1) f32            1x1 conv weight
    # b2_ref: (1,) f32               1x1 conv bias (SMEM)
    # o_ref : (1, 1, Cpad) f32       max-over-depth softmax, written at the last depth block
    # m_s, s_s: (1, Cpad) f32        running max / running sum(exp) over depth (VMEM scratch)
    db = pl.program_id(1)
    nd = pl.num_programs(1)
    Cpad = x_ref.shape[-1]

    w1 = w1_ref[...]                                  # hoisted out of the depth loop
    w2 = w2_ref[...]
    b2 = b2_ref[0]

    # In-VMEM "im2col": every 3x3 tap is a static lane shift of the flattened padded image.
    # For every kept output lane p = y*Wp + x (1<=y<=H, 1<=x<=W) the shifted index
    # p + (ky-1)*Wp + (kx-1) stays inside [0, Hp*Wp), so roll wrap-around only ever lands
    # on halo / tail-padding lanes, which the wrapper discards.
    X = x_ref[0].astype(jnp.float32)                  # (dt, G, Cpad)
    if Gp > G:                                        # 8-sublane-aligned tap blocks
        X = jnp.concatenate(
            [X, jnp.zeros((dt, Gp - G, Cpad), jnp.float32)], axis=1)   # (dt, Gp, Cpad)
    taps = []
    for ky in range(3):
        for kx in range(3):
            delta = (ky - 1) * Wp + (kx - 1)
            # jnp.roll (static shift) kept over pltpu.roll for lowering robustness at
            # non-native lane counts; it is a cheap VMEM-local shift either way.
            taps.append(X if delta == 0 else jnp.roll(X, -delta, axis=2))
    # (dt, 9*Gp, Cpad); bf16 operands -> single-pass MXU with f32 accumulation.
    P = jnp.concatenate(taps, axis=1).astype(jnp.bfloat16)

    lgs = []
    for j in range(dt):                               # static unroll over the depth tile
        h = jnp.dot(w1, P[j], preferred_element_type=jnp.float32)     # (16, Cpad)
        h = jnp.maximum(h, 0.0)                                       # ReLU
        # 1x1 conv (16 -> 1): VPU multiply + sublane reduction (no N=1 matmul).
        lgs.append(jnp.sum(h * w2, axis=0, keepdims=True) + b2)       # (1, Cpad)
    LG = jnp.concatenate(lgs, axis=0)                 # (dt, Cpad): full-sublane exp/max

    m_blk = jnp.max(LG, axis=0, keepdims=True)                        # (1, Cpad)
    s_blk = jnp.sum(jnp.exp(LG - m_blk), axis=0, keepdims=True)       # (1, Cpad)

    # Online max / sum(exp) across depth grid steps.
    @pl.when(db == 0)
    def _():
        m_s[...] = m_blk
        s_s[...] = s_blk

    @pl.when(db > 0)
    def _():
        m_new = jnp.maximum(m_s[...], m_blk)
        s_s[...] = s_s[...] * jnp.exp(m_s[...] - m_new) + s_blk * jnp.exp(m_blk - m_new)
        m_s[...] = m_new

    @pl.when(db == nd - 1)
    def _():
        # max_d softmax(lg)_d == 1 / sum_d exp(lg_d - max_d lg_d)
        s = s_s[...]
        inv = pl.reciprocal(s, approx=True)
        inv = inv * (2.0 - s * inv)                   # one Newton step -> ~f32-exact
        o_ref[0] = inv                                # lane-dense (1, Cpad) store


def _pick_depth_tile(D, target=8):
    for c in range(min(D, target), 0, -1):
        if D % c == 0:
            return c
    return 1


def pixel_view_weight(x, w1_t, w2_t, b2, *, depth_tile=8):
    """x: (B, G, D, H, W) f32. w1_t: (16, G, 3, 3). w2_t: (1, 16, 1, 1). b2: (1,).
    Returns (B, 1, H, W) f32 = max over D of softmax over D of conv2(relu(conv1(x)))."""
    B, G, D, H, W = x.shape
    Hp, Wp = H + 2, W + 2
    Cp = Hp * Wp
    Cpad = ((Cp + 127) // 128) * 128       # lane-dense flattened spatial axis
    Gp = ((G + 7) // 8) * 8                # 8-sublane-aligned tap blocks
    dt = _pick_depth_tile(D, depth_tile)   # depths per grid step

    # Roll-tap invariant: kept lanes shifted by any tap offset stay inside [0, Cp).
    assert (1 * Wp + 1) - (Wp + 1) >= 0 and (H * Wp + W) + (Wp + 1) <= Cp - 1

    # --- staging: only the 3x3 zero halo + flatten + lane pad (small fused copy, bf16).
    #     No overlapping-chunk / im2col copy is materialized in HBM.
    xp = jnp.pad(x, ((0, 0), (0, 0), (0, 0), (1, 1), (1, 1)))      # (B,G,D,Hp,Wp)
    xp = jnp.transpose(xp, (0, 2, 1, 3, 4))                        # (B,D,G,Hp,Wp): d-contig
    xf = xp.reshape(B, D, G, Cp)
    if Cpad > Cp:
        xf = jnp.pad(xf, ((0, 0), (0, 0), (0, 0), (0, Cpad - Cp)))
    xf = xf.astype(jnp.bfloat16)           # GEMM operand is bf16 anyway -> free accuracy-wise

    # weights in kernel layout (columns ordered (ky, kx, g); g zero-padded to Gp)
    w1r = jnp.transpose(w1_t, (0, 2, 3, 1))                        # (16, 3, 3, G)
    if Gp > G:
        w1r = jnp.pad(w1r, ((0, 0), (0, 0), (0, 0), (0, Gp - G)))
    w1 = w1r.reshape(16, 9 * Gp).astype(jnp.bfloat16)
    w2 = w2_t.reshape(16, 1).astype(jnp.float32)
    b2v = b2.reshape(1).astype(jnp.float32)

    kernel = functools.partial(_pvw_kernel, Wp=Wp, G=G, Gp=Gp, dt=dt)

    # Explicit VMEM budget: double-buffered bf16 input block + tap/P/h working set + stats,
    # with headroom, clamped to [16 MiB, 32 MiB] (<= v7x 64 MiB physical on all gens).
    work = dt * Cpad * (10 * Gp * 4 + 9 * Gp * 2 + 24 * 4)
    est = 2 * (dt * G * Cpad * 2) + work + 16 * Cpad * 4
    vmem_limit = int(min(max(4 * est, 16 * 1024 * 1024), 32 * 1024 * 1024))

    out = pl.pallas_call(
        kernel,
        out_shape=jax.ShapeDtypeStruct((B, 1, Cpad), jnp.float32),
        grid_spec=pltpu.PrefetchScalarGridSpec(
            num_scalar_prefetch=0,
            grid=(B, D // dt),                   # depth (softmax reduction) innermost
            in_specs=[
                pl.BlockSpec((1, dt, G, Cpad), lambda b, d: (b, d, 0, 0)),
                pl.BlockSpec((16, 9 * Gp), lambda b, d: (0, 0)),
                pl.BlockSpec((16, 1), lambda b, d: (0, 0)),
                pl.BlockSpec(memory_space=pltpu.MemorySpace.SMEM),
            ],
            out_specs=pl.BlockSpec((1, 1, Cpad), lambda b, d: (b, 0, 0)),
            scratch_shapes=[pltpu.VMEM((1, Cpad), jnp.float32),
                            pltpu.VMEM((1, Cpad), jnp.float32)],
        ),
        compiler_params=pltpu.CompilerParams(
            dimension_semantics=("parallel", "arbitrary"),
            vmem_limit_bytes=vmem_limit),
    )(xf, w1, w2, b2v)

    # drop the lane tail padding and the 1-row/1-col halo, back to NCHW
    out = out[:, 0, :Cp].reshape(B, Hp, Wp)[:, 1:H + 1, 1:W + 1]   # (B, H, W)
    return out.reshape(B, 1, H, W)


def pixel_view_weight_reference(x, w1_t, w2_t, b2):
    """Pure-JAX reference (XLA convs at HIGHEST precision)."""
    B, G, D, H, W = x.shape
    xr = jnp.transpose(x, (0, 2, 1, 3, 4)).reshape(B * D, G, H, W)
    dn = ("NCHW", "OIHW", "NCHW")
    y = jax.lax.conv_general_dilated(xr, w1_t, (1, 1), ((1, 1), (1, 1)),
                                     dimension_numbers=dn,
                                     precision=jax.lax.Precision.HIGHEST)
    y = jnp.maximum(y, 0.0)
    y = jax.lax.conv_general_dilated(y, w2_t, (1, 1), "VALID",
                                     dimension_numbers=dn,
                                     precision=jax.lax.Precision.HIGHEST)
    y = y + b2.reshape(1, 1, 1, 1)
    y = y.reshape(B, D, H, W)
    sm = jax.nn.softmax(y, axis=1)
    return jnp.max(sm, axis=1, keepdims=True)


if __name__ == "__main__":
    B, G, D, H, W = 2, 4, 8, 16, 16

    key = jax.random.PRNGKey(0)
    k1, k2, k3, kx = jax.random.split(key, 4)
    # deterministic synthetic parameters (shapes from the module __init__)
    w1_t = 0.2 * jax.random.normal(k1, (16, G, 3, 3), jnp.float32)   # ConvReLU(G,16) weight
    w2_t = 0.2 * jax.random.normal(k2, (1, 16, 1, 1), jnp.float32)   # Conv2d(16,1,1) weight
    b2 = 0.1 * jax.random.normal(k3, (1,), jnp.float32)              # Conv2d(16,1,1) bias
    x = jax.random.normal(kx, (B, G, D, H, W), jnp.float32)

    fn = jax.jit(pixel_view_weight)
    out = jax.block_until_ready(fn(x, w1_t, w2_t, b2))
    ref = jax.block_until_ready(pixel_view_weight_reference(x, w1_t, w2_t, b2))

    assert out.shape == (B, 1, H, W), out.shape
    # bf16 single-pass MXU operands vs the HIGHEST-precision f32 reference: worst-case
    # output error ~1e-3 at these shapes, so gate at 5e-3.
    assert bool(jnp.allclose(out, ref, atol=5e-3, rtol=5e-3)), \
        float(jnp.max(jnp.abs(out - ref)))
    print("KERNEL_OK")
</pallas_src>

<mosaic_0001>
module attributes {stable_mosaic.version = 11 : i64} {
  func.func @_pvw_kernel(%arg0: i32, %arg1: i32, %arg2: memref<1x8x4x384xbf16, #tpu.memory_space<vmem>>, %arg3: memref<16x72xbf16, #tpu.memory_space<vmem>>, %arg4: memref<16x1xf32, #tpu.memory_space<vmem>>, %arg5: memref<1xf32, #tpu.memory_space<smem>>, %arg6: memref<1x1x384xf32, #tpu.memory_space<vmem>>, %arg7: memref<1x384xf32, #tpu.memory_space<vmem>>, %arg8: memref<1x384xf32, #tpu.memory_space<vmem>>) attributes {dimension_semantics = [#tpu.dimension_semantics<parallel>, #tpu.dimension_semantics<arbitrary>], iteration_bounds = array<i64: 2, 1>, scalar_prefetch = 0 : i64, scratch_operands = 2 : i64, tpu.core_type = #tpu.core_type<tc>, window_params = [{transform_indices = @transform_0, window_bounds = array<i64: 1, 8, 4, 384>}, {pipeline_mode = #tpu.pipeline_mode<synchronous>, transform_indices = @transform_1, window_bounds = array<i64: 16, 72>}, {pipeline_mode = #tpu.pipeline_mode<synchronous>, transform_indices = @transform_2, window_bounds = array<i64: 16, 1>}, {transform_indices = @transform_3, window_bounds = array<i64: 1>}, {transform_indices = @transform_4, window_bounds = array<i64: 1, 1, 384>}]} {
    %c0 = arith.constant 0 : index
    %c0_0 = arith.constant 0 : index
    %0 = vector.load %arg3[%c0, %c0_0] : memref<16x72xbf16, #tpu.memory_space<vmem>>, vector<16x72xbf16>
    %c0_1 = arith.constant 0 : index
    %c0_2 = arith.constant 0 : index
    %1 = vector.load %arg4[%c0_1, %c0_2] : memref<16x1xf32, #tpu.memory_space<vmem>>, vector<16x1xf32>
    %c0_3 = arith.constant 0 : index
    %2 = memref.load %arg5[%c0_3] : memref<1xf32, #tpu.memory_space<smem>>
    %c0_4 = arith.constant 0 : index
    %c0_5 = arith.constant 0 : index
    %c0_6 = arith.constant 0 : index
    %c0_7 = arith.constant 0 : index
    %3 = vector.load %arg2[%c0_4, %c0_5, %c0_6, %c0_7] : memref<1x8x4x384xbf16, #tpu.memory_space<vmem>>, vector<1x8x4x384xbf16>
    %4 = vector.shape_cast %3 : vector<1x8x4x384xbf16> to vector<8x4x384xbf16>
    %5 = arith.extf %4 : vector<8x4x384xbf16> to vector<8x4x384xf32>
    %cst = arith.constant 0.000000e+00 : f32
    %6 = vector.broadcast %cst : f32 to vector<8x4x384xf32>
    %7 = tpu.concatenate %5, %6 in 1 : vector<8x4x384xf32>, vector<8x4x384xf32> -> vector<8x8x384xf32>
    %8 = vector.extract_strided_slice %7 {offsets = [0, 0, 365], sizes = [8, 8, 19], strides = [1, 1, 1]} : vector<8x8x384xf32> to vector<8x8x19xf32>
    %9 = vector.extract_strided_slice %7 {offsets = [0, 0, 0], sizes = [8, 8, 365], strides = [1, 1, 1]} : vector<8x8x384xf32> to vector<8x8x365xf32>
    %10 = tpu.concatenate %8, %9 in 2 : vector<8x8x19xf32>, vector<8x8x365xf32> -> vector<8x8x384xf32>
    %11 = vector.extract_strided_slice %7 {offsets = [0, 0, 366], sizes = [8, 8, 18], strides = [1, 1, 1]} : vector<8x8x384xf32> to vector<8x8x18xf32>
    %12 = vector.extract_strided_slice %7 {offsets = [0, 0, 0], sizes = [8, 8, 366], strides = [1, 1, 1]} : vector<8x8x384xf32> to vector<8x8x366xf32>
    %13 = tpu.concatenate %11, %12 in 2 : vector<8x8x18xf32>, vector<8x8x366xf32> -> vector<8x8x384xf32>
    %14 = vector.extract_strided_slice %7 {offsets = [0, 0, 367], sizes = [8, 8, 17], strides = [1, 1, 1]} : vector<8x8x384xf32> to vector<8x8x17xf32>
    %15 = vector.extract_strided_slice %7 {offsets = [0, 0, 0], sizes = [8, 8, 367], strides = [1, 1, 1]} : vector<8x8x384xf32> to vector<8x8x367xf32>
    %16 = tpu.concatenate %14, %15 in 2 : vector<8x8x17xf32>, vector<8x8x367xf32> -> vector<8x8x384xf32>
    %17 = vector.extract_strided_slice %7 {offsets = [0, 0, 383], sizes = [8, 8, 1], strides = [1, 1, 1]} : vector<8x8x384xf32> to vector<8x8x1xf32>
    %18 = vector.extract_strided_slice %7 {offsets = [0, 0, 0], sizes = [8, 8, 383], strides = [1, 1, 1]} : vector<8x8x384xf32> to vector<8x8x383xf32>
    %19 = tpu.concatenate %17, %18 in 2 : vector<8x8x1xf32>, vector<8x8x383xf32> -> vector<8x8x384xf32>
    %20 = vector.extract_strided_slice %7 {offsets = [0, 0, 1], sizes = [8, 8, 383], strides = [1, 1, 1]} : vector<8x8x384xf32> to vector<8x8x383xf32>
    %21 = vector.extract_strided_slice %7 {offsets = [0, 0, 0], sizes = [8, 8, 1], strides = [1, 1, 1]} : vector<8x8x384xf32> to vector<8x8x1xf32>
    %22 = tpu.concatenate %20, %21 in 2 : vector<8x8x383xf32>, vector<8x8x1xf32> -> vector<8x8x384xf32>
    %23 = vector.extract_strided_slice %7 {offsets = [0, 0, 17], sizes = [8, 8, 367], strides = [1, 1, 1]} : vector<8x8x384xf32> to vector<8x8x367xf32>
    %24 = vector.extract_strided_slice %7 {offsets = [0, 0, 0], sizes = [8, 8, 17], strides = [1, 1, 1]} : vector<8x8x384xf32> to vector<8x8x17xf32>
    %25 = tpu.concatenate %23, %24 in 2 : vector<8x8x367xf32>, vector<8x8x17xf32> -> vector<8x8x384xf32>
    %26 = vector.extract_strided_slice %7 {offsets = [0, 0, 18], sizes = [8, 8, 366], strides = [1, 1, 1]} : vector<8x8x384xf32> to vector<8x8x366xf32>
    %27 = vector.extract_strided_slice %7 {offsets = [0, 0, 0], sizes = [8, 8, 18], strides = [1, 1, 1]} : vector<8x8x384xf32> to vector<8x8x18xf32>
    %28 = tpu.concatenate %26, %27 in 2 : vector<8x8x366xf32>, vector<8x8x18xf32> -> vector<8x8x384xf32>
    %29 = vector.extract_strided_slice %7 {offsets = [0, 0, 19], sizes = [8, 8, 365], strides = [1, 1, 1]} : vector<8x8x384xf32> to vector<8x8x365xf32>
    %30 = vector.extract_strided_slice %7 {offsets = [0, 0, 0], sizes = [8, 8, 19], strides = [1, 1, 1]} : vector<8x8x384xf32> to vector<8x8x19xf32>
    %31 = tpu.concatenate %29, %30 in 2 : vector<8x8x365xf32>, vector<8x8x19xf32> -> vector<8x8x384xf32>
    %32 = tpu.concatenate %10, %13, %16, %19, %7, %22, %25, %28, %31 in 1 : vector<8x8x384xf32>, vector<8x8x384xf32>, vector<8x8x384xf32>, vector<8x8x384xf32>, vector<8x8x384xf32>, vector<8x8x384xf32>, vector<8x8x384xf32>, vector<8x8x384xf32>, vector<8x8x384xf32> -> vector<8x72x384xf32>
    %33 = arith.truncf %32 : vector<8x72x384xf32> to vector<8x72x384xbf16>
    %34 = vector.extract_strided_slice %33 {offsets = [0, 0, 0], sizes = [1, 72, 384], strides = [1, 1, 1]} : vector<8x72x384xbf16> to vector<1x72x384xbf16>
    %35 = vector.shape_cast %34 : vector<1x72x384xbf16> to vector<72x384xbf16>
    %cst_8 = arith.constant dense<0.000000e+00> : vector<16x384xf32>
    %36 = tpu.matmul %0, %35, %cst_8 {dimension_numbers = #tpu.dot_dimension_numbers<[1], [0], [0], [1], [0, 0, 1, 1], [], []>} : vector<16x72xbf16>, vector<72x384xbf16>, vector<16x384xf32> -> vector<16x384xf32>
    %cst_9 = arith.constant 0.000000e+00 : f32
    %37 = vector.broadcast %cst_9 : f32 to vector<16x384xf32>
    %38 = arith.maximumf %36, %37 : vector<16x384xf32>
    %39 = vector.broadcast %1 : vector<16x1xf32> to vector<16x384xf32>
    %40 = arith.mulf %38, %39 : vector<16x384xf32>
    %cst_10 = arith.constant dense<0.000000e+00> : vector<384xf32>
    %41 = vector.multi_reduction <add>, %40, %cst_10 [0] : vector<16x384xf32> to vector<384xf32>
    %42 = vector.shape_cast %41 : vector<384xf32> to vector<1x384xf32>
    %43 = vector.broadcast %2 : f32 to vector<1x384xf32>
    %44 = arith.addf %42, %43 : vector<1x384xf32>
    %45 = vector.extract_strided_slice %33 {offsets = [1, 0, 0], sizes = [1, 72, 384], strides = [1, 1, 1]} : vector<8x72x384xbf16> to vector<1x72x384xbf16>
    %46 = vector.shape_cast %45 : vector<1x72x384xbf16> to vector<72x384xbf16>
    %cst_11 = arith.constant dense<0.000000e+00> : vector<16x384xf32>
    %47 = tpu.matmul %0, %46, %cst_11 {dimension_numbers = #tpu.dot_dimension_numbers<[1], [0], [0], [1], [0, 0, 1, 1], [], []>} : vector<16x72xbf16>, vector<72x384xbf16>, vector<16x384xf32> -> vector<16x384xf32>
    %cst_12 = arith.constant 0.000000e+00 : f32
    %48 = vector.broadcast %cst_12 : f32 to vector<16x384xf32>
    %49 = arith.maximumf %47, %48 : vector<16x384xf32>
    %50 = vector.broadcast %1 : vector<16x1xf32> to vector<16x384xf32>
    %51 = arith.mulf %49, %50 : vector<16x384xf32>
    %cst_13 = arith.constant dense<0.000000e+00> : vector<384xf32>
    %52 = vector.multi_reduction <add>, %51, %cst_13 [0] : vector<16x384xf32> to vector<384xf32>
    %53 = vector.shape_cast %52 : vector<384xf32> to vector<1x384xf32>
    %54 = vector.broadcast %2 : f32 to vector<1x384xf32>
    %55 = arith.addf %53, %54 : vector<1x384xf32>
    %56 = vector.extract_strided_slice %33 {offsets = [2, 0, 0], sizes = [1, 72, 384], strides = [1, 1, 1]} : vector<8x72x384xbf16> to vector<1x72x384xbf16>
    %57 = vector.shape_cast %56 : vector<1x72x384xbf16> to vector<72x384xbf16>
    %cst_14 = arith.constant dense<0.000000e+00> : vector<16x384xf32>
    %58 = tpu.matmul %0, %57, %cst_14 {dimension_numbers = #tpu.dot_dimension_numbers<[1], [0], [0], [1], [0, 0, 1, 1], [], []>} : vector<16x72xbf16>, vector<72x384xbf16>, vector<16x384xf32> -> vector<16x384xf32>
    %cst_15 = arith.constant 0.000000e+00 : f32
    %59 = vector.broadcast %cst_15 : f32 to vector<16x384xf32>
    %60 = arith.maximumf %58, %59 : vector<16x384xf32>
    %61 = vector.broadcast %1 : vector<16x1xf32> to vector<16x384xf32>
    %62 = arith.mulf %60, %61 : vector<16x384xf32>
    %cst_16 = arith.constant dense<0.000000e+00> : vector<384xf32>
    %63 = vector.multi_reduction <add>, %62, %cst_16 [0] : vector<16x384xf32> to vector<384xf32>
    %64 = vector.shape_cast %63 : vector<384xf32> to vector<1x384xf32>
    %65 = vector.broadcast %2 : f32 to vector<1x384xf32>
    %66 = arith.addf %64, %65 : vector<1x384xf32>
    %67 = vector.extract_strided_slice %33 {offsets = [3, 0, 0], sizes = [1, 72, 384], strides = [1, 1, 1]} : vector<8x72x384xbf16> to vector<1x72x384xbf16>
    %68 = vector.shape_cast %67 : vector<1x72x384xbf16> to vector<72x384xbf16>
    %cst_17 = arith.constant dense<0.000000e+00> : vector<16x384xf32>
    %69 = tpu.matmul %0, %68, %cst_17 {dimension_numbers = #tpu.dot_dimension_numbers<[1], [0], [0], [1], [0, 0, 1, 1], [], []>} : vector<16x72xbf16>, vector<72x384xbf16>, vector<16x384xf32> -> vector<16x384xf32>
    %cst_18 = arith.constant 0.000000e+00 : f32
    %70 = vector.broadcast %cst_18 : f32 to vector<16x384xf32>
    %71 = arith.maximumf %69, %70 : vector<16x384xf32>
    %72 = vector.broadcast %1 : vector<16x1xf32> to vector<16x384xf32>
    %73 = arith.mulf %71, %72 : vector<16x384xf32>
    %cst_19 = arith.constant dense<0.000000e+00> : vector<384xf32>
    %74 = vector.multi_reduction <add>, %73, %cst_19 [0] : vector<16x384xf32> to vector<384xf32>
    %75 = vector.shape_cast %74 : vector<384xf32> to vector<1x384xf32>
    %76 = vector.broadcast %2 : f32 to vector<1x384xf32>
    %77 = arith.addf %75, %76 : vector<1x384xf32>
    %78 = vector.extract_strided_slice %33 {offsets = [4, 0, 0], sizes = [1, 72, 384], strides = [1, 1, 1]} : vector<8x72x384xbf16> to vector<1x72x384xbf16>
    %79 = vector.shape_cast %78 : vector<1x72x384xbf16> to vector<72x384xbf16>
    %cst_20 = arith.constant dense<0.000000e+00> : vector<16x384xf32>
    %80 = tpu.matmul %0, %79, %cst_20 {dimension_numbers = #tpu.dot_dimension_numbers<[1], [0], [0], [1], [0, 0, 1, 1], [], []>} : vector<16x72xbf16>, vector<72x384xbf16>, vector<16x384xf32> -> vector<16x384xf32>
    %cst_21 = arith.constant 0.000000e+00 : f32
    %81 = vector.broadcast %cst_21 : f32 to vector<16x384xf32>
    %82 = arith.maximumf %80, %81 : vector<16x384xf32>
    %83 = vector.broadcast %1 : vector<16x1xf32> to vector<16x384xf32>
    %84 = arith.mulf %82, %83 : vector<16x384xf32>
    %cst_22 = arith.constant dense<0.000000e+00> : vector<384xf32>
    %85 = vector.multi_reduction <add>, %84, %cst_22 [0] : vector<16x384xf32> to vector<384xf32>
    %86 = vector.shape_cast %85 : vector<384xf32> to vector<1x384xf32>
    %87 = vector.broadcast %2 : f32 to vector<1x384xf32>
    %88 = arith.addf %86, %87 : vector<1x384xf32>
    %89 = vector.extract_strided_slice %33 {offsets = [5, 0, 0], sizes = [1, 72, 384], strides = [1, 1, 1]} : vector<8x72x384xbf16> to vector<1x72x384xbf16>
    %90 = vector.shape_cast %89 : vector<1x72x384xbf16> to vector<72x384xbf16>
    %cst_23 = arith.constant dense<0.000000e+00> : vector<16x384xf32>
    %91 = tpu.matmul %0, %90, %cst_23 {dimension_numbers = #tpu.dot_dimension_numbers<[1], [0], [0], [1], [0, 0, 1, 1], [], []>} : vector<16x72xbf16>, vector<72x384xbf16>, vector<16x384xf32> -> vector<16x384xf32>
    %cst_24 = arith.constant 0.000000e+00 : f32
    %92 = vector.broadcast %cst_24 : f32 to vector<16x384xf32>
    %93 = arith.maximumf %91, %92 : vector<16x384xf32>
    %94 = vector.broadcast %1 : vector<16x1xf32> to vector<16x384xf32>
    %95 = arith.mulf %93, %94 : vector<16x384xf32>
    %cst_25 = arith.constant dense<0.000000e+00> : vector<384xf32>
    %96 = vector.multi_reduction <add>, %95, %cst_25 [0] : vector<16x384xf32> to vector<384xf32>
    %97 = vector.shape_cast %96 : vector<384xf32> to vector<1x384xf32>
    %98 = vector.broadcast %2 : f32 to vector<1x384xf32>
    %99 = arith.addf %97, %98 : vector<1x384xf32>
    %100 = vector.extract_strided_slice %33 {offsets = [6, 0, 0], sizes = [1, 72, 384], strides = [1, 1, 1]} : vector<8x72x384xbf16> to vector<1x72x384xbf16>
    %101 = vector.shape_cast %100 : vector<1x72x384xbf16> to vector<72x384xbf16>
    %cst_26 = arith.constant dense<0.000000e+00> : vector<16x384xf32>
    %102 = tpu.matmul %0, %101, %cst_26 {dimension_numbers = #tpu.dot_dimension_numbers<[1], [0], [0], [1], [0, 0, 1, 1], [], []>} : vector<16x72xbf16>, vector<72x384xbf16>, vector<16x384xf32> -> vector<16x384xf32>
    %cst_27 = arith.constant 0.000000e+00 : f32
    %103 = vector.broadcast %cst_27 : f32 to vector<16x384xf32>
    %104 = arith.maximumf %102, %103 : vector<16x384xf32>
    %105 = vector.broadcast %1 : vector<16x1xf32> to vector<16x384xf32>
    %106 = arith.mulf %104, %105 : vector<16x384xf32>
    %cst_28 = arith.constant dense<0.000000e+00> : vector<384xf32>
    %107 = vector.multi_reduction <add>, %106, %cst_28 [0] : vector<16x384xf32> to vector<384xf32>
    %108 = vector.shape_cast %107 : vector<384xf32> to vector<1x384xf32>
    %109 = vector.broadcast %2 : f32 to vector<1x384xf32>
    %110 = arith.addf %108, %109 : vector<1x384xf32>
    %111 = vector.extract_strided_slice %33 {offsets = [7, 0, 0], sizes = [1, 72, 384], strides = [1, 1, 1]} : vector<8x72x384xbf16> to vector<1x72x384xbf16>
    %112 = vector.shape_cast %111 : vector<1x72x384xbf16> to vector<72x384xbf16>
    %cst_29 = arith.constant dense<0.000000e+00> : vector<16x384xf32>
    %113 = tpu.matmul %0, %112, %cst_29 {dimension_numbers = #tpu.dot_dimension_numbers<[1], [0], [0], [1], [0, 0, 1, 1], [], []>} : vector<16x72xbf16>, vector<72x384xbf16>, vector<16x384xf32> -> vector<16x384xf32>
    %cst_30 = arith.constant 0.000000e+00 : f32
    %114 = vector.broadcast %cst_30 : f32 to vector<16x384xf32>
    %115 = arith.maximumf %113, %114 : vector<16x384xf32>
    %116 = vector.broadcast %1 : vector<16x1xf32> to vector<16x384xf32>
    %117 = arith.mulf %115, %116 : vector<16x384xf32>
    %cst_31 = arith.constant dense<0.000000e+00> : vector<384xf32>
    %118 = vector.multi_reduction <add>, %117, %cst_31 [0] : vector<16x384xf32> to vector<384xf32>
    %119 = vector.shape_cast %118 : vector<384xf32> to vector<1x384xf32>
    %120 = vector.broadcast %2 : f32 to vector<1x384xf32>
    %121 = arith.addf %119, %120 : vector<1x384xf32>
    %122 = tpu.concatenate %44, %55, %66, %77, %88, %99, %110, %121 in 0 : vector<1x384xf32>, vector<1x384xf32>, vector<1x384xf32>, vector<1x384xf32>, vector<1x384xf32>, vector<1x384xf32>, vector<1x384xf32>, vector<1x384xf32> -> vector<8x384xf32>
    %cst_32 = arith.constant dense<0xFF800000> : vector<384xf32>
    %123 = vector.multi_reduction <maximumf>, %122, %cst_32 [0] : vector<8x384xf32> to vector<384xf32>
    %124 = vector.shape_cast %123 : vector<384xf32> to vector<1x384xf32>
    %125 = vector.broadcast %124 : vector<1x384xf32> to vector<8x384xf32>
    %126 = arith.subf %122, %125 : vector<8x384xf32>
    %127 = math.exp %126 : vector<8x384xf32>
    %cst_33 = arith.constant dense<0.000000e+00> : vector<384xf32>
    %128 = vector.multi_reduction <add>, %127, %cst_33 [0] : vector<8x384xf32> to vector<384xf32>
    %129 = vector.shape_cast %128 : vector<384xf32> to vector<1x384xf32>
    %c0_i32 = arith.constant 0 : i32
    %130 = arith.cmpi eq, %arg1, %c0_i32 : i32
    %131 = arith.extui %130 : i1 to i32
    %c0_i32_34 = arith.constant 0 : i32
    %132 = arith.cmpi ne, %131, %c0_i32_34 : i32
    scf.if %132 {
      %c0_39 = arith.constant 0 : index
      %c0_40 = arith.constant 0 : index
      %139 = vector.load %arg7[%c0_39, %c0_40] : memref<1x384xf32, #tpu.memory_space<vmem>>, vector<1x384xf32>
      tpu.vector_store %arg7[%c0_39, %c0_40], %124 {strides = array<i32>} : memref<1x384xf32, #tpu.memory_space<vmem>>, vector<1x384xf32>,
      %c0_41 = arith.constant 0 : index
      %c0_42 = arith.constant 0 : index
      %140 = vector.load %arg8[%c0_41, %c0_42] : memref<1x384xf32, #tpu.memory_space<vmem>>, vector<1x384xf32>
      tpu.vector_store %arg8[%c0_41, %c0_42], %129 {strides = array<i32>} : memref<1x384xf32, #tpu.memory_space<vmem>>, vector<1x384xf32>,
    } else {
    }
    %c0_i32_35 = arith.constant 0 : i32
    %133 = arith.cmpi sgt, %arg1, %c0_i32_35 : i32
    %134 = arith.extui %133 : i1 to i32
    %c0_i32_36 = arith.constant 0 : i32
    %135 = arith.cmpi ne, %134, %c0_i32_36 : i32
    scf.if %135 {
      %c0_39 = arith.constant 0 : index
      %c0_40 = arith.constant 0 : index
      %139 = vector.load %arg7[%c0_39, %c0_40] : memref<1x384xf32, #tpu.memory_space<vmem>>, vector<1x384xf32>
      %140 = arith.maximumf %139, %124 : vector<1x384xf32>
      %c0_41 = arith.constant 0 : index
      %c0_42 = arith.constant 0 : index
      %141 = vector.load %arg8[%c0_41, %c0_42] : memref<1x384xf32, #tpu.memory_space<vmem>>, vector<1x384xf32>
      %c0_43 = arith.constant 0 : index
      %c0_44 = arith.constant 0 : index
      %142 = vector.load %arg7[%c0_43, %c0_44] : memref<1x384xf32, #tpu.memory_space<vmem>>, vector<1x384xf32>
      %143 = arith.subf %142, %140 : vector<1x384xf32>
      %144 = math.exp %143 : vector<1x384xf32>
      %145 = arith.mulf %141, %144 : vector<1x384xf32>
      %146 = arith.subf %124, %140 : vector<1x384xf32>
      %147 = math.exp %146 : vector<1x384xf32>
      %148 = arith.mulf %129, %147 : vector<1x384xf32>
      %149 = arith.addf %145, %148 : vector<1x384xf32>
      %c0_45 = arith.constant 0 : index
      %c0_46 = arith.constant 0 : index
      %150 = vector.load %arg8[%c0_45, %c0_46] : memref<1x384xf32, #tpu.memory_space<vmem>>, vector<1x384xf32>
      tpu.vector_store %arg8[%c0_45, %c0_46], %149 {strides = array<i32>} : memref<1x384xf32, #tpu.memory_space<vmem>>, vector<1x384xf32>,
      %c0_47 = arith.constant 0 : index
      %c0_48 = arith.constant 0 : index
      %151 = vector.load %arg7[%c0_47, %c0_48] : memref<1x384xf32, #tpu.memory_space<vmem>>, vector<1x384xf32>
      tpu.vector_store %arg7[%c0_47, %c0_48], %140 {strides = array<i32>} : memref<1x384xf32, #tpu.memory_space<vmem>>, vector<1x384xf32>,
    } else {
    }
    %c0_i32_37 = arith.constant 0 : i32
    %136 = arith.cmpi eq, %arg1, %c0_i32_37 : i32
    %137 = arith.extui %136 : i1 to i32
    %c0_i32_38 = arith.constant 0 : i32
    %138 = arith.cmpi ne, %137, %c0_i32_38 : i32
    scf.if %138 {
      %c0_39 = arith.constant 0 : index
      %c0_40 = arith.constant 0 : index
      %139 = vector.load %arg8[%c0_39, %c0_40] : memref<1x384xf32, #tpu.memory_space<vmem>>, vector<1x384xf32>
      %140 = tpu.reciprocal %139 {approx = true} : vector<1x384xf32> -> vector<1x384xf32>
      %141 = arith.mulf %139, %140 : vector<1x384xf32>
      %cst_41 = arith.constant 2.000000e+00 : f32
      %142 = vector.broadcast %cst_41 : f32 to vector<1x384xf32>
      %143 = arith.subf %142, %141 : vector<1x384xf32>
      %144 = arith.mulf %140, %143 : vector<1x384xf32>
      %c0_42 = arith.constant 0 : index
      %c0_43 = arith.constant 0 : index
      %c0_44 = arith.constant 0 : index
      %145 = vector.load %arg6[%c0_42, %c0_43, %c0_44] : memref<1x1x384xf32, #tpu.memory_space<vmem>>, vector<1x1x384xf32>
      %146 = vector.shape_cast %145 : vector<1x1x384xf32> to vector<1x384xf32>
      %147 = vector.shape_cast %144 : vector<1x384xf32> to vector<1x1x384xf32>
      tpu.vector_store %arg6[%c0_42, %c0_43, %c0_44], %147 {strides = array<i32>} : memref<1x1x384xf32, #tpu.memory_space<vmem>>, vector<1x1x384xf32>,
    } else {
    }
    return
  }
  func.func @transform_0(%arg0: i32, %arg1: i32) -> (i32, i32, i32, i32) {
    %c0_i32 = arith.constant 0 : i32
    %c0_i32_0 = arith.constant 0 : i32
    %c0_i32_1 = arith.constant 0 : i32
    return %arg0, %arg1, %c0_i32, %c0_i32_0 : i32, i32, i32, i32
  }
  func.func @transform_1(%arg0: i32, %arg1: i32) -> (i32, i32) {
    %c0_i32 = arith.constant 0 : i32
    %c0_i32_0 = arith.constant 0 : i32
    %c0_i32_1 = arith.constant 0 : i32
    return %c0_i32, %c0_i32_0 : i32, i32
  }
  func.func @transform_2(%arg0: i32, %arg1: i32) -> (i32, i32) {
    %c0_i32 = arith.constant 0 : i32
    %c0_i32_0 = arith.constant 0 : i32
    %c0_i32_1 = arith.constant 0 : i32
    return %c0_i32, %c0_i32_0 : i32, i32
  }
  func.func @transform_3(%arg0: i32, %arg1: i32) -> i32 {
    %c0_i32 = arith.constant 0 : i32
    %c0_i32_0 = arith.constant 0 : i32
    return %c0_i32 : i32
  }
  func.func @transform_4(%arg0: i32, %arg1: i32) -> (i32, i32, i32) {
    %c0_i32 = arith.constant 0 : i32
    %c0_i32_0 = arith.constant 0 : i32
    %c0_i32_1 = arith.constant 0 : i32
    return %arg0, %c0_i32, %c0_i32_0 : i32, i32, i32
  }
}

</mosaic_0001>

<bundles_post_ra>
// kernel: squeeze.1
= control target key start
LH: loop header
LB: loop body
LE: loop exit
PB: predicated region body
PF: predicated region fallthrough
CT: control target
= control target key end

     0   :  { %s128_s12 = smov 3  ;;  %s20_s13 = smov 3  ;;  %vm17_vm0 = vcmask 146432   ;;  %vm133_vm1 = vcmask 1014784   ;;  %vm146_vm2 = vcmask 1031168   ;;  %vm137_vm3 = vcmask 31744   ;;  %s307_s0 = inlined_call_operand.vmem [shape: f32[2,324], index: 0, kind: input, shape index: {}]   ;;  %s308_s1 = inlined_call_operand.vmem [shape: f32[2,18,18], index: 1, kind: output, shape index: {}]  }
   0x1   :  { %v14_v0 = vld [vmem:[%s307_s0] sm:$0x3]  ;;  %v157_v1 = vld [vmem:[%s307_s0 + $0x4] sm:$0x3]  ;;  %v158_v2 = vld [vmem:[%s307_s0 + $0x2] sm:$0x3] }
   0x2   :  { %15 = vst [vmem:[#allocation0] sm:$0x3] %v14_v0  ;;  %9 = vst [vmem:[#allocation0 + $0x10] sm:$0x3] %v157_v1  ;;  %s131_s0 = smov 3  ;;  %s28_s14 = smov 3 }
   0x3   :  { %13 = vst [vmem:[#allocation0 + $0x8] sm:$0x3] %v158_v2  ;;  %s195_s15 = smov 110   ;;  %s196_s18 = smov 114   ;;  %vm140_vm4 = vcmask 146464   ;;  %vm150_vm5 = vcmask 15360  }
   0x4   :  { %s42_s19 = smov 3  ;;  %s197_s20 = smov 4   ;;  %vm153_vm6 = vcmask 146448  }
   0x5   :  { %s198_s21 = smov 112   ;;  %s50_s22 = smov 3 }
   0x6   :  { %s199_s23 = smov 2   ;;  %s200_s24 = smov 96  }
   0x7   :  { %s64_s25 = smov 3  ;;  %s72_s26 = smov 3 }
   0x8   :  { %s201_s27 = smov 94   ;;  %s202_s28 = smov 92  }
   0x9   :  { %v35_v3 = vld [vmem:[#allocation0] sm:$0x3]   ;;  %v132_v5 = vld [vmem:[#allocation0 + $0x11] ss:$-1 sm:%s131_s0]   ;;  %s86_s29 = smov 3  ;;  %s203_s30 = smov 78  }
   0xa   :  { %v16_v4 = vld [vmem:[#allocation0] sm:$0x3]   ;;  %36 = vrot.lane.b32.xlu0 %v35_v3, %s195_s15  ;;  %v129_v6 = vld [vmem:[#allocation0 + $0x9] ss:$-1 sm:%s128_s12]   ;;  %v21_v7 = vld [vmem:[#allocation0 + $0x11] ss:$-1 sm:%s20_s13]  }
   0xb   :  { %18 = vst.msk [vmem:[%s308_s1] ss:$24 sm:$0x3] %vm17_vm0, %v16_v4   ;;  %v134_v8 = vsel %vm133_vm1, %v132_v5, %v129_v6  ;;  %22 = vrot.lane.b32.xlu1 %v21_v7, %s196_s18  ;;  %v143_v9 = vld [vmem:[#allocation0] sm:$0x3]   ;;  %s204_s2 = smov 76  }
   0xc   :  { %v145_v10 = vld [vmem:[#allocation0 + $0x8] sm:$0x3]   ;;  %v43_v13 = vld [vmem:[#allocation0 + $0x11] ss:$-1 sm:%s42_s19]   ;;  %v57_v15 = vld [vmem:[#allocation0] sm:$0x3]  }
   0xd   :  { %v29_v11 = vld [vmem:[#allocation0 + $0x9] ss:$-1 sm:%s28_s14]   ;;  %v147_v12 = vsel %vm146_vm2, %v145_v10, %v143_v9  ;;  %v65_v16 = vld [vmem:[#allocation0 + $0x11] ss:$-1 sm:%s64_s25]   ;;  %v79_v18 = vld [vmem:[#allocation0] sm:$0x3]  }
   0xe   :  { %135 = vrot.lane.b32.xlu0 %v134_v8, %s197_s20  ;;  %v51_v14 = vld [vmem:[#allocation0 + $0x9] ss:$-1 sm:%s50_s22]   ;;  %s100_s3 = smov 3  ;;  %s205_s4 = smov 74   ;;  %v93_v20 = vld [vmem:[#allocation0] sm:$0x3]  }
   0xf   :  { %30 = vrot.lane.b32.xlu1 %v29_v11, %s198_s21  ;;  %v73_v17 = vld [vmem:[#allocation0 + $0x9] ss:$-1 sm:%s72_s26]   ;;  %s206_s5 = smov 58   ;;  %s114_s6 = smov 3  ;;  %v107_v22 = vld [vmem:[#allocation0] sm:$0x3]  }
  0x10   :  { %v87_v19 = vld [vmem:[#allocation0 + $0x9] ss:$-1 sm:%s86_s29]   ;;  %s207_s7 = smov 56   ;;  %s208_s8 = smov 40   ;;  %v121_v24 = vld [vmem:[#allocation0] sm:$0x3]  }
  0x11   :  { %v101_v21 = vld [vmem:[#allocation0 + $0x9] ss:$-1 sm:%s100_s3]   ;;  %s209_s9 = smov 38   ;;  %s210_s10 = smov 22  }
  0x12   :  { %148 = vrot.lane.b32.xlu0 %v147_v12, %s199_s23  ;;  %v115_v23 = vld [vmem:[#allocation0 + $0x9] ss:$-1 sm:%s114_s6]   ;;  %s211_s11 = smov 20  }
  0x13   :  { %44 = vrot.lane.b32.xlu1 %v43_v13, %s200_s24 }
  0x16   :  { %52 = vrot.lane.b32.xlu0 %v51_v14, %s201_s27 }
  0x17   :  { %58 = vrot.lane.b32.xlu1 %v57_v15, %s202_s28 }
  0x1a   :  { %66 = vrot.lane.b32.xlu0 %v65_v16, %s203_s30 }
  0x1b   :  { %74 = vrot.lane.b32.xlu1 %v73_v17, %s204_s2 }
  0x1e   :  { %80 = vrot.lane.b32.xlu0 %v79_v18, %s205_s4 }
  0x1f   :  { %88 = vrot.lane.b32.xlu1 %v87_v19, %s206_s5 }
  0x22   :  { %94 = vrot.lane.b32.xlu0 %v93_v20, %s207_s7 }
  0x23   :  { %102 = vrot.lane.b32.xlu1 %v101_v21, %s208_s8 }
  0x26   :  { %108 = vrot.lane.b32.xlu0 %v107_v22, %s209_s9 }
  0x27   :  { %116 = vrot.lane.b32.xlu1 %v115_v23, %s210_s10 }
  0x2a   :  { %122 = vrot.lane.b32.xlu0 %v121_v24, %s211_s11 }
  0x7c   :  { %v37_v25 = vpop.permute.xlu0 %36  }
  0x7d   :  { %161 = vst.msk [vmem:[%s308_s1 + $0x1] ss:$24 sm:$0x3] %vm17_vm0, %v37_v25   ;;  %v23_v26 = vpop.permute.xlu1 %22  }
  0x7e   :  { %159 = vst.msk [vmem:[%s308_s1 + $0x27] ss:$-24 sm:$0x3] %vm17_vm0, %v23_v26  }
  0x80   :  { %v136_v27 = vpop.permute.xlu0 %135  }
  0x81   :  { %174 = vst.msk [vmem:[%s308_s1 + $0x26] ss:$-24 sm:$0x3] %vm137_vm3, %v136_v27   ;;  %v31_v28 = vpop.permute.xlu1 %30  }
  0x82   :  { %175 = vst.msk [vmem:[%s308_s1 + $0x26] ss:$-24 sm:$0x3] %vm140_vm4, %v136_v27  }
  0x83   :  { %160 = vst.msk [vmem:[%s308_s1 + $0x20] ss:$-24 sm:$0x3] %vm17_vm0, %v31_v28  }
  0x84   :  { %v149_v29 = vpop.permute.xlu0 %148  }
  0x85   :  { %176 = vst.msk [vmem:[%s308_s1 + $0x7] ss:$24 sm:$0x3] %vm150_vm5, %v149_v29   ;;  %v45_v30 = vpop.permute.xlu1 %44  }
  0x86   :  { %177 = vst.msk [vmem:[%s308_s1 + $0x7] ss:$24 sm:$0x3] %vm153_vm6, %v149_v29  }
  0x87   :  { %162 = vst.msk [vmem:[%s308_s1 + $0x28] ss:$-24 sm:$0x3] %vm17_vm0, %v45_v30  }
  0x88   :  { %v53_v31 = vpop.permute.xlu0 %52  }
  0x89   :  { %163 = vst.msk [vmem:[%s308_s1 + $0x21] ss:$-24 sm:$0x3] %vm17_vm0, %v53_v31   ;;  %v59_v32 = vpop.permute.xlu1 %58  }
  0x8a   :  { %164 = vst.msk [vmem:[%s308_s1 + $0x2] ss:$24 sm:$0x3] %vm17_vm0, %v59_v32  }
  0x8c   :  { %v67_v33 = vpop.permute.xlu0 %66  }
  0x8d   :  { %165 = vst.msk [vmem:[%s308_s1 + $0x29] ss:$-24 sm:$0x3] %vm17_vm0, %v67_v33   ;;  %v75_v34 = vpop.permute.xlu1 %74  }
  0x8e   :  { %166 = vst.msk [vmem:[%s308_s1 + $0x22] ss:$-24 sm:$0x3] %vm17_vm0, %v75_v34  }
  0x90   :  { %v81_v35 = vpop.permute.xlu0 %80  }
  0x91   :  { %167 = vst.msk [vmem:[%s308_s1 + $0x3] ss:$24 sm:$0x3] %vm17_vm0, %v81_v35   ;;  %v89_v36 = vpop.permute.xlu1 %88  }
  0x92   :  { %168 = vst.msk [vmem:[%s308_s1 + $0x23] ss:$-24 sm:$0x3] %vm17_vm0, %v89_v36  }
  0x94   :  { %v95_v37 = vpop.permute.xlu0 %94  }
  0x95   :  { %169 = vst.msk [vmem:[%s308_s1 + $0x4] ss:$24 sm:$0x3] %vm17_vm0, %v95_v37   ;;  %v103_v38 = vpop.permute.xlu1 %102  }
  0x96   :  { %170 = vst.msk [vmem:[%s308_s1 + $0x24] ss:$-24 sm:$0x3] %vm17_vm0, %v103_v38  }
  0x98   :  { %v109_v39 = vpop.permute.xlu0 %108  }
  0x99   :  { %171 = vst.msk [vmem:[%s308_s1 + $0x5] ss:$24 sm:$0x3] %vm17_vm0, %v109_v39   ;;  %v117_v40 = vpop.permute.xlu1 %116  }
  0x9a   :  { %172 = vst.msk [vmem:[%s308_s1 + $0x25] ss:$-24 sm:$0x3] %vm17_vm0, %v117_v40  }
  0x9c   :  { %v123_v41 = vpop.permute.xlu0 %122  }
  0x9d   :  { %173 = vst.msk [vmem:[%s308_s1 + $0x6] ss:$24 sm:$0x3] %vm17_vm0, %v123_v41  }

// kernel: pixel_view_weight.1
= control target key start
LH: loop header
LB: loop body
LE: loop exit
PB: predicated region body
PF: predicated region fallthrough
CT: control target
= control target key end

     0   :  { %s3503_s17 = smov 0   ;;  %s3505_s18 = smov 0   ;;  %s4524_s0 = inlined_call_operand.vmem [shape: bf16[2,8,4,384], index: 0, kind: input, shape index: {}]   ;;  %s4525_s1 = inlined_call_operand.vmem [shape: bf16[16,72], index: 1, kind: input, shape index: {}]   ;;  %s4526_s2 = inlined_call_operand.vmem [shape: f32[16,1], index: 2, kind: input, shape index: {}]   ;;  %s4527_s3 = inlined_call_operand.<no memory space> [shape: f32[1], index: 3, kind: input, shape index: {}]   ;;  %s4528_s4 = inlined_call_operand.vmem [shape: f32[2,1,384], index: 4, kind: output, shape index: {}]  }
   0x1   :  { %9 = sst [smem:[#allocation4]] %s4527_s3  ;;  %s3507_s19 = smov 0  }
   0x2 LB: > { %s27_s3 = sadd.s32 1, %s3456_s18  ;;  %p2666_p0 = scmp.ge.s32.totalorder %s3460_s19, 1  ;;  %s3460_s19 = sphi %s3507_s19, %s15_s19   ;;  %s3456_s18 = sphi %s3505_s18, %s4536_s18   ;;  %s3452_s17 = sphi %s3503_s17, %s4535_s17  }
   0x3   : > { %p29_p1 = scmp.ge.s32.totalorder %s27_s3, 2  ;;  %p183_p2 = scmp.lt.s32.totalorder %s3460_s19, 3 }
   0x5   : > { %s4538_s3 = smov (%p29_p1, %s27_s3), 0  ;;  %p184_p3 = pnand %p2666_p0, %p183_p2 }
   0x6   : > { %p214_p4 = scmp.lt.s32.totalorder (!%p184_p3), %s3452_s17, 1  ;;  %s3462_s24 = smov (!%p184_p3), 109  }
   0x7   : > { %187 = sbr.rel (%p184_p3) target bundleno = 640 (0x280), region = 36  ;;  %s3463_s25 = smov (!%p184_p3), 111  }
   0x8   : > { %s3464_s26 = smov (!%p184_p3), 110   ;;  %s3465_s27 = smov (!%p184_p3), 127  }
   0x9   : > { %s3467_s28 = smov (!%p184_p3), 17   ;;  %s3468_s29 = smov (!%p184_p3), 1  }
   0xa   : > { %s3469_s30 = smov (!%p184_p3), 19   ;;  %s3470_s5 = smov (!%p184_p3), 18  }
   0xb   : > { %s233_s14 = sld [smem:[#allocation4]] (!%p184_p3) }
   0xc   : > { %s4540_s17 = smov (!%p214_p4, %s3452_s17), 1  ;;  %vm282_vm0 = vcmask 1043456   ;;  %v3466_v16 = vmov 0.0   ;;  %v3471_v19 = vmov 0   ;;  %vm3472_vm1 = vmmov 0  }
   0xd   : > { %s2927_s20 = smul.u32 48, %s4540_s17  ;;  %2815 = vmatprep.subr.bf16.mxu1 %v3466_v16  ;;  %1341 = vmatprep.mubr.bf16.mxu0 %v3471_v19  ;;  %vm1114_vm2 = vcmask 891904   ;;  %vm904_vm3 = vcmask 908288   ;;  %vm1009_vm4 = vcmask 900096   ;;  %vm799_vm5 = vcmask 1039360  }
   0xe   : > { %2825 = vmatprep.mubr.msk.bf16.mxu1 %vm3472_vm1, %v3466_v16  ;;  %3427 = vset.pattern.permute.xlu1 %v3471_v19  ;;  %vm3473_vm6 = vmmov 1   ;;  %vm597_vm8 = vcmask 138240   ;;  %vm702_vm9 = vcmask 7168   ;;  %vm387_vm10 = vcmask 154624   ;;  %s2928_s15 = smul.u32 3, %s4540_s17 }
   0xf   : > { %s3527_s23 = scalar_lea.vmem %s4524_s0, %s2927_s20  ;;  %3426 = vset.pattern.permute.xlu0 %v3471_v19  ;;  %vm3741_vm7 = vmpackc.low %vm3473_vm6, %vm282_vm0  ;;  %vm492_vm11 = vcmask 146432   ;;  %vm1296_vm12 = vcmask 588800   ;;  %vm2343_vm13 = vcmask 1040384   ;;  %vm2347_vm14 = vcmask 1041408  }
  0x10   : > { %v3530_v0 = vld [vmem:[%s3527_s23] sm:$0x3f]  ;;  %v3533_v1 = vld [vmem:[%s3527_s23 + $0x6] sm:$0x3f]  ;;  %v3588_v22 = vld [vmem:[%s3527_s23 + $0xc] sm:$0x3f]  ;;  %s227_s21 = scalar_lea.vmem %s4528_s4, %s2928_s15 }
  0x11   : > { %v243_v2 = vunpack.c.h.bf16 %v3530_v0  ;;  %v3537_v3 = vunpack.c.l.bf16 %v3533_v1  ;;  %v3540_v4 = vunpack.c.l.bf16 %v3530_v0  ;;  %v245_v17 = vunpack.c.h.bf16 %v3533_v1  ;;  %v3597_v24 = vld [vmem:[%s3527_s23 + $0x12] sm:$0x3f]  ;;  %v3648_v42 = vld [vmem:[%s3527_s23 + $0x18] sm:$0x3f]  ;;  %v3657_v44 = vld [vmem:[%s3527_s23 + $0x1e] sm:$0x3f] }
  0x12   : > { %v3592_v23 = vunpack.c.l.bf16 %v3588_v22  ;;  %v247_v26 = vunpack.c.h.bf16 %v3588_v22  ;;  %v3606_v27 = vunpack.c.l.bf16 %v3597_v24  ;;  %v249_v38 = vunpack.c.h.bf16 %v3597_v24 }
  0x13   : > { %v285_v5 = vsel %vm282_vm0, %v243_v2, 0.0  ;;  %v286_v6 = vsel %vm282_vm0, %v3537_v3, 0.0  ;;  %v3549_v7 = vcombine.high %v3540_v4, %v3540_v4  ;;  %v283_v8 = vsel %vm282_vm0, %v3540_v4, 0.0 }
  0x14   : > { %v2966_v9 = vpack.i.bf16 %v286_v6, %v285_v5  ;;  %v3555_v10 = vcombine.high %v3537_v3, %v3537_v3  ;;  %v288_v18 = vsel %vm282_vm0, %v245_v17, 0.0  ;;  %v3601_v25 = vcombine.high %v3592_v23, %v3592_v23 }
  0x15   : > { %v284_v11 = vsel %vm282_vm0, %v3549_v7, 0.0  ;;  %v3051_v21 = vpack.i.bf16 %v286_v6, %v288_v18  ;;  %v289_v28 = vsel %vm282_vm0, %v3592_v23, 0.0  ;;  %v291_v30 = vsel %vm282_vm0, %v247_v26, 0.0 }
  0x16   : > { %2967 = vrot.lane.b32.xlu0 %v2966_v9, %s3462_s24  ;;  %v2976_v12 = vpack.i.bf16 %v285_v5, %v284_v11  ;;  %v2971_v13 = vpack.i.bf16 %v284_v11, %v283_v8  ;;  %v287_v14 = vsel %vm282_vm0, %v3555_v10, 0.0  ;;  %v290_v29 = vsel %vm282_vm0, %v3601_v25, 0.0 }
  0x17   : > { %v2986_v15 = vpack.i.bf16 %v287_v14, %v283_v8  ;;  %v3046_v20 = vpack.i.bf16 %v288_v18, %v287_v14  ;;  %v292_v31 = vsel %vm282_vm0, %v3606_v27, 0.0  ;;  %v3086_v32 = vpack.i.bf16 %v290_v29, %v289_v28 }
  0x18   : > { %2977 = vrot.lane.b32.xlu1 %v2976_v12, %s3463_s25  ;;  %v3622_v33 = vcombine.high %v3606_v27, %v3606_v27  ;;  %v3091_v34 = vpack.i.bf16 %v292_v31, %v291_v30  ;;  %v3096_v35 = vpack.i.bf16 %v291_v30, %v290_v29  ;;  %v294_v39 = vsel %vm282_vm0, %v249_v38, 0.0 }
  0x19   : > { %v3171_v41 = vpack.i.bf16 %v292_v31, %v294_v39  ;;  %v3652_v43 = vunpack.c.l.bf16 %v3648_v42  ;;  %v251_v46 = vunpack.c.h.bf16 %v3648_v42  ;;  %v3666_v47 = vunpack.c.l.bf16 %v3657_v44 }
  0x1a   : > { %2972 = vrot.lane.b32.xlu0 %v2971_v13, %s3462_s24  ;;  %v293_v36 = vsel %vm282_vm0, %v3622_v33, 0.0  ;;  %v253_v60 = vunpack.c.h.bf16 %v3657_v44  ;;  %vm2351_vm15 = vcmask 1042432  }
  0x1b   : > { %v3106_v37 = vpack.i.bf16 %v293_v36, %v289_v28  ;;  %v3166_v40 = vpack.i.bf16 %v294_v39, %v293_v36  ;;  %v3661_v45 = vcombine.high %v3652_v43, %v3652_v43  ;;  %v295_v48 = vsel %vm282_vm0, %v3652_v43, 0.0 }
  0x1c   : > { %2982 = vrot.lane.b32.xlu1 %v2976_v12, %s3464_s26  ;;  %v297_v50 = vsel %vm282_vm0, %v251_v46, 0.0  ;;  %v298_v51 = vsel %vm282_vm0, %v3666_v47, 0.0  ;;  %v3682_v53 = vcombine.high %v3666_v47, %v3666_v47  ;;  %v300_v11 = vsel %vm282_vm0, %v253_v60, 0.0 }
  0x1d   : > { %v296_v49 = vsel %vm282_vm0, %v3661_v45, 0.0  ;;  %v3211_v54 = vpack.i.bf16 %v298_v51, %v297_v50 }
  0x1e   : > { %2987 = vrot.lane.b32.xlu0 %v2986_v15, %s3463_s25  ;;  %v3206_v52 = vpack.i.bf16 %v296_v49, %v295_v48  ;;  %v3216_v55 = vpack.i.bf16 %v297_v50, %v296_v49  ;;  %v299_v56 = vsel %vm282_vm0, %v3682_v53, 0.0 }
  0x1f   : > { %v3226_v57 = vpack.i.bf16 %v299_v56, %v295_v48  ;;  %v3291_v48 = vpack.i.bf16 %v298_v51, %v300_v11 }
  0x20   : > { %2992 = vrot.lane.b32.xlu1 %v2986_v15, %s3464_s26 }
  0x22   : > { %2997 = vrot.lane.b32.xlu0 %v2976_v12, %s3465_s27 }
  0x24   : > { %3002 = vrot.lane.b32.xlu1 %v2986_v15, %s3465_s27 }
  0x26   : > { %3007 = vrot.lane.b32.xlu0 %v2971_v13, %s3467_s28 }
  0x28   : > { %3012 = vrot.lane.b32.xlu1 %v2971_v13, %s3468_s29 }
  0x2a   : > { %3017 = vrot.lane.b32.xlu0 %v2966_v9, %s3467_s28 }
  0x2c   : > { %3022 = vrot.lane.b32.xlu1 %v2966_v9, %s3468_s29 }
  0x2e   : > { %3027 = vrot.lane.b32.xlu0 %v2971_v13, %s3469_s30 }
  0x30   : > { %3032 = vrot.lane.b32.xlu1 %v2971_v13, %s3470_s5 }
  0x32   : > { %3037 = vrot.lane.b32.xlu0 %v2966_v9, %s3469_s30 }
  0x34   : > { %3042 = vrot.lane.b32.xlu1 %v2966_v9, %s3470_s5 }
  0x36   : > { %3047 = vrot.lane.b32.xlu0 %v3046_v20, %s3462_s24 }
  0x38   : > { %3052 = vrot.lane.b32.xlu1 %v3051_v21, %s3463_s25 }
  0x3a   : > { %3057 = vrot.lane.b32.xlu0 %v3051_v21, %s3464_s26 }
  0x3c   : > { %3062 = vrot.lane.b32.xlu1 %v3051_v21, %s3465_s27 }
  0x3e   : > { %3067 = vrot.lane.b32.xlu0 %v3046_v20, %s3467_s28 }
  0x40   : > { %3072 = vrot.lane.b32.xlu1 %v3046_v20, %s3468_s29 }
  0x42   : > { %3077 = vrot.lane.b32.xlu0 %v3046_v20, %s3469_s30 }
  0x44   : > { %3082 = vrot.lane.b32.xlu1 %v3046_v20, %s3470_s5 }
  0x46   : > { %3087 = vrot.lane.b32.xlu0 %v3086_v32, %s3462_s24 }
  0x48   : > { %3092 = vrot.lane.b32.xlu1 %v3091_v34, %s3462_s24 }
  0x4a   : > { %3097 = vrot.lane.b32.xlu0 %v3096_v35, %s3463_s25 }
  0x4c   : > { %3102 = vrot.lane.b32.xlu1 %v3096_v35, %s3464_s26 }
  0x4e   : > { %3107 = vrot.lane.b32.xlu0 %v3106_v37, %s3463_s25 }
  0x50   : > { %3112 = vrot.lane.b32.xlu1 %v3106_v37, %s3464_s26 }
  0x52   : > { %3117 = vrot.lane.b32.xlu0 %v3096_v35, %s3465_s27 }
  0x54   : > { %3122 = vrot.lane.b32.xlu1 %v3106_v37, %s3465_s27  ;;  %v3721_v37 = vpack.i.bf16 %v300_v11, %v299_v56 }
  0x56   : > { %3127 = vrot.lane.b32.xlu0 %v3086_v32, %s3467_s28 }
  0x58   : > { %3132 = vrot.lane.b32.xlu1 %v3086_v32, %s3468_s29 }
  0x5a   : > { %3137 = vrot.lane.b32.xlu0 %v3091_v34, %s3467_s28 }
  0x5c   : > { %3142 = vrot.lane.b32.xlu1 %v3091_v34, %s3468_s29 }
  0x5e   : > { %3147 = vrot.lane.b32.xlu0 %v3086_v32, %s3469_s30 }
  0x60   : > { %3152 = vrot.lane.b32.xlu1 %v3086_v32, %s3470_s5 }
  0x62   : > { %3157 = vrot.lane.b32.xlu0 %v3091_v34, %s3469_s30 }
  0x64   : > { %3162 = vrot.lane.b32.xlu1 %v3091_v34, %s3470_s5 }
  0x66   : > { %3167 = vrot.lane.b32.xlu0 %v3166_v40, %s3462_s24 }
  0x68   : > { %3172 = vrot.lane.b32.xlu1 %v3171_v41, %s3463_s25 }
  0x6a   : > { %3177 = vrot.lane.b32.xlu0 %v3171_v41, %s3464_s26 }
  0x6c   : > { %3182 = vrot.lane.b32.xlu1 %v3171_v41, %s3465_s27 }
  0x6e   : > { %3187 = vrot.lane.b32.xlu0 %v3166_v40, %s3467_s28 }
  0x70   : > { %3192 = vrot.lane.b32.xlu1 %v3166_v40, %s3468_s29 }
  0x72   : > { %3197 = vrot.lane.b32.xlu0 %v3166_v40, %s3469_s30 }
  0x74   : > { %3202 = vrot.lane.b32.xlu1 %v3166_v40, %s3470_s5 }
  0x76   : > { %3207 = vrot.lane.b32.xlu0 %v3206_v52, %s3462_s24 }
  0x78   : > { %3212 = vrot.lane.b32.xlu1 %v3211_v54, %s3462_s24 }
  0x7a   : > { %3217 = vrot.lane.b32.xlu0 %v3216_v55, %s3463_s25 }
  0x7c   : > { %3222 = vrot.lane.b32.xlu1 %v3216_v55, %s3464_s26 }
  0x7e   : > { %3227 = vrot.lane.b32.xlu0 %v3226_v57, %s3463_s25 }
  0x80   : > { %3232 = vrot.lane.b32.xlu1 %v3226_v57, %s3464_s26 }
  0x82   : > { %3237 = vrot.lane.b32.xlu0 %v3216_v55, %s3465_s27 }
  0x84   : > { %3242 = vrot.lane.b32.xlu1 %v3226_v57, %s3465_s27 }
  0x86   : > { %3247 = vrot.lane.b32.xlu0 %v3206_v52, %s3467_s28 }
  0x88   : > { %v3696_v58 = vpop.permute.xlu0 %2967  ;;  %3252 = vrot.lane.b32.xlu1 %v3206_v52, %s3468_s29 }
  0x89   : > { %v2969_v61 = vunpack.i.l.bf16 %v3696_v58 }
  0x8a   : > { %v2978_v59 = vpop.permute.xlu1 %2977  ;;  %3257 = vrot.lane.b32.xlu0 %v3211_v54, %s3467_s28 }
  0x8b   : > { %v2980_v63 = vunpack.i.h.bf16 %v2978_v59  ;;  %v2979_v5 = vunpack.i.l.bf16 %v2978_v59 }
  0x8c   : > { %3262 = vrot.lane.b32.xlu1 %v3211_v54, %s3468_s29  ;;  %v2973_v62 = vpop.permute.xlu0 %2972 }
  0x8d   : > { %v2975_v6 = vunpack.i.h.bf16 %v2973_v62  ;;  %v2974_v8 = vunpack.i.l.bf16 %v2973_v62  ;;  %v906_v31 = vsel %vm904_vm3, %v2979_v5, %v2980_v63 }
  0x8e   : > { %v2983_v9 = vpop.permute.xlu1 %2982  ;;  %3267 = vrot.lane.b32.xlu0 %v3206_v52, %s3469_s30 }
  0x8f   : > { %v2985_v12 = vunpack.i.h.bf16 %v2983_v9  ;;  %v2984_v13 = vunpack.i.l.bf16 %v2983_v9  ;;  %v1116_v14 = vsel %vm1114_vm2, %v2975_v6, %v2969_v61  ;;  %v1115_v15 = vsel %vm1114_vm2, %v2974_v8, %v2975_v6 }
  0x90   : > { %3272 = vrot.lane.b32.xlu1 %v3206_v52, %s3470_s5  ;;  %v3710_v18 = vpop.permute.xlu0 %2987  ;;  %v1184_v20 = vpack.c.bf16 %v1116_v14, %v1116_v14  ;;  %v1183_v21 = vpack.c.bf16 %v1115_v15, %v1115_v15  ;;  %v1163_v28 = vsel %vm1114_vm2, %v2969_v61, %v2974_v8  ;;  %v3729_v52 = vld [vmem:[%s3527_s23 + $0x24] sm:$0x3f]  ;;  %v3753_v15 = vld [vmem:[%s3527_s23 + $0x2a] sm:$0x3f] }
  0x91   : > { %v2989_v29 = vunpack.i.l.bf16 %v3710_v18  ;;  %v1185_v30 = vpack.c.bf16 %v1163_v28, %v1163_v28  ;;  %v1011_v32 = vsel %vm1009_vm4, %v2984_v13, %v2985_v12  ;;  %v3746_v6 = vunpack.c.l.bf16 %v3729_v52 }
  0x92   : > { %v3716_v34 = vpop.permute.xlu1 %2992  ;;  %3277 = vrot.lane.b32.xlu0 %v3211_v54, %s3469_s30  ;;  %2669 = vmatprep.subr.msk.bf16.mxu0 %vm282_vm0, %v1184_v20  ;;  %v1301_v35 = vsel %vm282_vm0, %v1183_v21, 0  ;;  %v1181_v36 = vpack.c.bf16 %v1011_v32, %v906_v31 }
  0x93   : > { %v2994_v39 = vunpack.i.l.bf16 %v3716_v34  ;;  %1316 = vmatpush1.bf16.msra.mxu0 %v1301_v35  ;;  %v1307_v40 = vsel %vm282_vm0, %v1185_v30, 0  ;;  %v905_v49 = vsel %vm904_vm3, %v2989_v29, %v2979_v5  ;;  %v953_v50 = vsel %vm904_vm3, %v2980_v63, %v2989_v29 }
  0x94   : > { %2816 = vmatpush3.bf16.msra.mxu1 %v1307_v40  ;;  %3282 = vrot.lane.b32.xlu1 %v3211_v54, %s3470_s5  ;;  %v2998_v41 = vpop.permute.xlu0 %2997  ;;  %v3765_v31 = vcombine.high %v3746_v6, %v3746_v6 }
  0x95   : > { %v3000_v55 = vunpack.i.h.bf16 %v2998_v41  ;;  %v2999_v56 = vunpack.i.l.bf16 %v2998_v41  ;;  %1317 = vmatprep.subr.bf16.mxu0 %v1181_v36  ;;  %2817 = vmatprep.subr.bf16.mxu1 %v3466_v16  ;;  %v1010_v57 = vsel %vm1009_vm4, %v2994_v39, %v2984_v13  ;;  %v1058_v59 = vsel %vm1009_vm4, %v2985_v12, %v2994_v39 }
  0x96   : > { %v3734_v61 = vpop.permute.xlu1 %3002  ;;  %3287 = vrot.lane.b32.xlu0 %v3721_v37, %s3462_s24  ;;  %v1180_v51 = vpack.c.bf16 %v1010_v57, %v905_v49  ;;  %v1182_v54 = vpack.c.bf16 %v1058_v59, %v953_v50  ;;  %v301_v41 = vsel %vm282_vm0, %v3746_v6, 0.0 }
  0x97   : > { %v801_v62 = vsel %vm799_vm5, %v2999_v56, %v3000_v55  ;;  %v3004_v63 = vunpack.i.l.bf16 %v3734_v61 }
  0x98   : > { %v2671_v8 = vpack.c.bf16 %v801_v62, %v3549_v7  ;;  %3292 = vrot.lane.b32.xlu1 %v3291_v48, %s3463_s25  ;;  %v3008_v9 = vpop.permute.xlu0 %3007  ;;  %1318 = vmatpush1.bf16.msra.mxu0 %v1180_v51 }
  0x99   : > { %v800_v11 = vsel %vm799_vm5, %v3004_v63, %v2999_v56  ;;  %v848_v12 = vsel %vm799_vm5, %v3000_v55, %v3004_v63  ;;  %v3010_v13 = vunpack.i.h.bf16 %v3008_v9  ;;  %v3009_v14 = vunpack.i.l.bf16 %v3008_v9  ;;  %2818 = vmatpush3.bf16.msra.mxu1 %v1182_v54 }
  0x9a   : > { %v2674_v20 = vpack.c.bf16 %v800_v11, %v3540_v4  ;;  %v2678_v21 = vpack.c.bf16 %v848_v12, %v243_v2  ;;  %v3013_v7 = vpop.permute.xlu1 %3012  ;;  %3297 = vrot.lane.b32.xlu0 %v3291_v48, %s3464_s26  ;;  %2672 = vmatprep.subr.msk.bf16.mxu0 %vm3741_vm7, %v2671_v8  ;;  %v4529_v2 = vunpack.c.h.bf16 %v3729_v52  ;;  %v3774_v4 = vunpack.c.l.bf16 %v3753_v15 }
  0x9b   : > { %v3015_v28 = vunpack.i.h.bf16 %v3013_v7  ;;  %v3014_v29 = vunpack.i.l.bf16 %v3013_v7  ;;  %2819 = vmatprep.subr.bf16.mxu1 %v3466_v16  ;;  %v598_v30 = vsel %vm597_vm8, %v3009_v14, %v3010_v13 }
  0x9c   : > { %3302 = vrot.lane.b32.xlu1 %v3291_v48, %s3465_s27  ;;  %v3768_v0 = vpop.permute.xlu0 %3017  ;;  %2675 = vmatpush1.bf16.msk.msra.mxu0 %vm3741_vm7, %v2674_v20  ;;  %v302_v48 = vsel %vm282_vm0, %v3765_v31, 0.0  ;;  %v3797_v56 = vsel %vm282_vm0, %v4529_v2, 0.0  ;;  %v3801_v57 = vsel %vm282_vm0, %v3774_v4, 0.0  ;;  %v3812_v20 = vcombine.high %v3774_v4, %v3774_v4 }
  0x9d   : > { %v3019_v32 = vunpack.i.l.bf16 %v3768_v0  ;;  %2820 = vmatpush3.bf16.msk.msra.mxu1 %vm3741_vm7, %v2678_v21  ;;  %v703_v35 = vsel %vm702_vm9, %v3014_v29, %v3015_v28  ;;  %v3807_v11 = vpack.i.bf16 %v302_v48, %v301_v41  ;;  %v3331_v7 = vpack.i.bf16 %v3801_v57, %v3797_v56 }
  0x9e   : > { %v3780_v36 = vpop.permute.xlu1 %3022  ;;  %3307 = vrot.lane.b32.xlu0 %v3721_v37, %s3467_s28  ;;  %v1175_v39 = vpack.c.bf16 %v703_v35, %v598_v30  ;;  %2821 = vmatprep.subr.bf16.mxu1 %v3466_v16  ;;  %v3336_v35 = vpack.i.bf16 %v3797_v56, %v302_v48 }
  0x9f   : > { %v3024_v40 = vunpack.i.l.bf16 %v3780_v36  ;;  %v638_v50 = vsel %vm597_vm8, %v3019_v32, %v3009_v14  ;;  %v599_v55 = vsel %vm597_vm8, %v3010_v13, %v3019_v32 }
  0xa0   : > { %3312 = vrot.lane.b32.xlu1 %v3721_v37, %s3468_s29  ;;  %v3028_v49 = vpop.permute.xlu0 %3027  ;;  %1321 = vmatprep.subr.bf16.mxu0 %v1175_v39  ;;  %v3831_v39 = vsel %vm282_vm0, %v3812_v20, 0.0 }
  0xa1   : > { %v3030_v59 = vunpack.i.h.bf16 %v3028_v49  ;;  %v3029_v51 = vunpack.i.l.bf16 %v3028_v49  ;;  %v743_v54 = vsel %vm702_vm9, %v3024_v40, %v3014_v29  ;;  %v704_v62 = vsel %vm702_vm9, %v3015_v28, %v3024_v40 }
  0xa2   : > { %v3033_v63 = vpop.permute.xlu1 %3032  ;;  %3317 = vrot.lane.b32.xlu0 %v3721_v37, %s3469_s30  ;;  %v1174_v8 = vpack.c.bf16 %v743_v54, %v638_v50  ;;  %v1176_v9 = vpack.c.bf16 %v704_v62, %v599_v55  ;;  %v2970_v40 = vunpack.i.h.bf16 %v3696_v58  ;;  %v3346_v58 = vpack.i.bf16 %v3831_v39, %v301_v41 }
  0xa3   : > { %v3035_v12 = vunpack.i.h.bf16 %v3033_v63  ;;  %v3034_v13 = vunpack.i.l.bf16 %v3033_v63  ;;  %v388_v14 = vsel %vm387_vm10, %v3029_v51, %v3030_v59 }
  0xa4   : > { %3322 = vrot.lane.b32.xlu1 %v3721_v37, %s3470_s5  ;;  %v3816_v21 = vpop.permute.xlu0 %3037  ;;  %1322 = vmatpush1.bf16.msra.mxu0 %v1174_v8 }
  0xa5   : > { %v3039_v28 = vunpack.i.l.bf16 %v3816_v21  ;;  %2822 = vmatpush3.bf16.msra.mxu1 %v1176_v9  ;;  %v493_v29 = vsel %vm492_vm11, %v3034_v13, %v3035_v12 }
  0xa6   : > { %v3822_v30 = vpop.permute.xlu1 %3042  ;;  %3327 = vrot.lane.b32.xlu0 %v3807_v11, %s3462_s24  ;;  %v1172_v32 = vpack.c.bf16 %v493_v29, %v388_v14  ;;  %2823 = vmatprep.subr.bf16.mxu1 %v3466_v16 }
  0xa7   : > { %v3044_v37 = vunpack.i.l.bf16 %v3822_v30  ;;  %v428_v50 = vsel %vm387_vm10, %v3039_v28, %v3029_v51  ;;  %v389_v55 = vsel %vm387_vm10, %v3030_v59, %v3039_v28  ;;  %v3845_v51 = vld [vmem:[%s4525_s1] sm:$0xff]  }
  0xa8   : > { %3332 = vrot.lane.b32.xlu1 %v3331_v7, %s3462_s24  ;;  %v3048_v49 = vpop.permute.xlu0 %3047  ;;  %1323 = vmatprep.subr.bf16.mxu0 %v1172_v32 }
  0xa9   : > { %v3050_v48 = vunpack.i.h.bf16 %v3048_v49  ;;  %v3049_v54 = vunpack.i.l.bf16 %v3048_v49  ;;  %v533_v62 = vsel %vm492_vm11, %v3044_v37, %v3034_v13  ;;  %v494_v63 = vsel %vm492_vm11, %v3035_v12, %v3044_v37 }
  0xaa   : > { %v3053_v8 = vpop.permute.xlu1 %3052  ;;  %3337 = vrot.lane.b32.xlu0 %v3336_v35, %s3463_s25  ;;  %v1171_v9 = vpack.c.bf16 %v533_v62, %v428_v50  ;;  %v1173_v14 = vpack.c.bf16 %v494_v63, %v389_v55  ;;  %v2990_v50 = vunpack.i.h.bf16 %v3710_v18  ;;  %v2995_v55 = vunpack.i.h.bf16 %v3716_v34 }
  0xab   : > { %v1118_v7 = vsel %vm1114_vm2, %v3049_v54, %v3050_v48  ;;  %v1117_v59 = vsel %vm1114_vm2, %v2970_v40, %v3049_v54  ;;  %v3055_v13 = vunpack.i.h.bf16 %v3053_v8  ;;  %v1164_v32 = vsel %vm1114_vm2, %v3050_v48, %v2970_v40 }
  0xac   : > { %v1199_v28 = vpack.c.bf16 %v1118_v7, %v1118_v7  ;;  %3342 = vrot.lane.b32.xlu1 %v3336_v35, %s3464_s26  ;;  %v3058_v12 = vpop.permute.xlu0 %3057  ;;  %1324 = vmatpush1.bf16.msra.mxu0 %v1171_v9  ;;  %v1198_v29 = vpack.c.bf16 %v1117_v59, %v1117_v59  ;;  %v3054_v37 = vunpack.i.l.bf16 %v3053_v8  ;;  %v1200_v63 = vpack.c.bf16 %v1164_v32, %v1164_v32 }
  0xad   : > { %v3060_v41 = vunpack.i.h.bf16 %v3058_v12  ;;  %v3059_v49 = vunpack.i.l.bf16 %v3058_v12  ;;  %2824 = vmatpush3.bf16.msra.mxu1 %v1173_v14  ;;  %v3005_v9 = vunpack.i.h.bf16 %v3734_v61  ;;  %v907_v18 = vsel %vm904_vm3, %v3055_v13, %v2990_v50 }
  0xae   : > { %v3063_v62 = vpop.permute.xlu1 %3062  ;;  %3347 = vrot.lane.b32.xlu0 %v3346_v58, %s3463_s25  ;;  %2681 = vmatprep.subr.msk.bf16.mxu0 %vm282_vm0, %v1199_v28  ;;  %v1441_v54 = vsel %vm282_vm0, %v1198_v29, 0  ;;  %v1447_v14 = vsel %vm282_vm0, %v1200_v63, 0  ;;  %v954_v7 = vsel %vm904_vm3, %v3054_v37, %v3055_v13 }
  0xaf   : > { %v1059_v40 = vsel %vm1009_vm4, %v3059_v49, %v3060_v41  ;;  %v3065_v48 = vunpack.i.h.bf16 %v3063_v62  ;;  %v3064_v8 = vunpack.i.l.bf16 %v3063_v62  ;;  %2829 = vmatprep.subr.bf16.mxu1 %v3466_v16  ;;  %2676 = vmatmul.mubr.msk.bf16.vlgmr.msra.gmra.mxu0 %vm1296_vm12, %v3845_v51  ;;  %v1013_v61 = vsel %vm1009_vm4, %v2995_v55, %v3059_v49 }
  0xb0   : > { %3352 = vrot.lane.b32.xlu1 %v3346_v58, %s3464_s26  ;;  %v3068_v34 = vpop.permute.xlu0 %3067  ;;  %2826 = vmatmul.mubr.msk.bf16.vlgmr.msra.gmra.mxu1 %vm1296_vm12, %v3845_v51  ;;  %v1012_v59 = vsel %vm1009_vm4, %v3060_v41, %v2995_v55  ;;  %v1197_v12 = vpack.c.bf16 %v1059_v40, %v954_v7  ;;  %v908_v62 = vsel %vm904_vm3, %v2990_v50, %v3054_v37  ;;  %v3025_v41 = vunpack.i.h.bf16 %v3780_v36 }
  0xb1   : > { %v803_v28 = vsel %vm799_vm5, %v3005_v9, %v3064_v8  ;;  %1456 = vmatpush1.bf16.msra.mxu0 %v1441_v54  ;;  %2830 = vmatpush3.bf16.msra.mxu1 %v1447_v14  ;;  %v802_v29 = vsel %vm799_vm5, %v3065_v48, %v3005_v9  ;;  %v3069_v63 = vunpack.i.l.bf16 %v3068_v34  ;;  %v1196_v2 = vpack.c.bf16 %v1013_v61, %v908_v62 }
  0xb2   : > { %v3073_v32 = vpop.permute.xlu1 %3072  ;;  %3357 = vrot.lane.b32.xlu0 %v3336_v35, %s3465_s27  ;;  %2831 = vmatprep.subr.bf16.mxu1 %v3466_v16  ;;  %v2683_v49 = vpack.c.bf16 %v803_v28, %v3555_v10  ;;  %v1195_v55 = vpack.c.bf16 %v1012_v59, %v907_v18  ;;  %v849_v54 = vsel %vm799_vm5, %v3064_v8, %v3065_v48  ;;  %v3020_v50 = vunpack.i.h.bf16 %v3768_v0 }
  0xb3   : > { %v3074_v13 = vunpack.i.l.bf16 %v3073_v32  ;;  %1481 = vmatprep.mubr.bf16.mxu0 %v3471_v19  ;;  %2839 = vmatprep.mubr.msk.bf16.mxu1 %vm3472_vm1, %v3466_v16  ;;  %v3075_v35 = vunpack.i.h.bf16 %v3073_v32  ;;  %v3040_v10 = vunpack.i.h.bf16 %v3816_v21  ;;  %v3070_v9 = vunpack.i.h.bf16 %v3068_v34 }
  0xb4   : > { %3362 = vrot.lane.b32.xlu1 %v3346_v58, %s3465_s27  ;;  %v3078_v37 = vpop.permute.xlu0 %3077  ;;  %1457 = vmatprep.subr.bf16.mxu0 %v1196_v2  ;;  %v3045_v40 = vunpack.i.h.bf16 %v3822_v30  ;;  %v2686_v14 = vpack.c.bf16 %v802_v29, %v3537_v3  ;;  %v2690_v0 = vpack.c.bf16 %v849_v54, %v245_v17  ;;  %v600_v3 = vsel %vm597_vm8, %v3020_v50, %v3069_v63 }
  0xb5   : > { %2832 = vmatpush3.bf16.msra.mxu1 %v1197_v12  ;;  %v3079_v61 = vunpack.i.l.bf16 %v3078_v37  ;;  %1458 = vmatpush1.bf16.msra.mxu0 %v1195_v55  ;;  %v705_v58 = vsel %vm702_vm9, %v3025_v41, %v3074_v13  ;;  %v601_v21 = vsel %vm597_vm8, %v3069_v63, %v3070_v9  ;;  %v706_v30 = vsel %vm702_vm9, %v3074_v13, %v3075_v35 }
  0xb6   : > { %v3083_v36 = vpop.permute.xlu1 %3082  ;;  %3367 = vrot.lane.b32.xlu0 %v3807_v11, %s3467_s28  ;;  %2684 = vmatprep.subr.msk.bf16.mxu0 %vm3741_vm7, %v2683_v49  ;;  %v744_v48 = vsel %vm702_vm9, %v3075_v35, %v3025_v41  ;;  %v1190_v17 = vpack.c.bf16 %v705_v58, %v600_v3  ;;  %v257_v7 = vunpack.c.h.bf16 %v3753_v15  ;;  %v639_v59 = vsel %vm597_vm8, %v3070_v9, %v3020_v50 }
  0xb7   : > { %v3084_v2 = vunpack.i.l.bf16 %v3083_v36  ;;  %2833 = vmatprep.subr.bf16.mxu1 %v3466_v16  ;;  %v3085_v8 = vunpack.i.h.bf16 %v3083_v36  ;;  %v3080_v28 = vunpack.i.h.bf16 %v3078_v37  ;;  %v390_v29 = vsel %vm387_vm10, %v3040_v10, %v3079_v61 }
  0xb8   : > { %3372 = vrot.lane.b32.xlu1 %v3807_v11, %s3468_s29  ;;  %v3088_v1 = vpop.permute.xlu0 %3087  ;;  %v1189_v62 = vpack.c.bf16 %v744_v48, %v639_v59  ;;  %v1191_v49 = vpack.c.bf16 %v706_v30, %v601_v21 }
  0xb9   : > { %v3090_v18 = vunpack.i.h.bf16 %v3088_v1  ;;  %v3089_v34 = vunpack.i.l.bf16 %v3088_v1  ;;  %2834 = vmatpush3.bf16.msk.msra.mxu1 %vm3741_vm7, %v2690_v0  ;;  %2687 = vmatpush1.bf16.msk.msra.mxu0 %vm3741_vm7, %v2686_v14  ;;  %v495_v32 = vsel %vm492_vm11, %v3045_v40, %v3084_v2  ;;  %v391_v41 = vsel %vm387_vm10, %v3079_v61, %v3080_v28 }
  0xba   : > { %v3904_v12 = vpop.permute.xlu1 %3092  ;;  %553 = vrot.lane.b32.xlu0 %v3797_v56, %s3467_s28  ;;  %1461 = vmatprep.subr.bf16.mxu0 %v1190_v17  ;;  %v1187_v13 = vpack.c.bf16 %v495_v32, %v390_v29  ;;  %v496_v55 = vsel %vm492_vm11, %v3084_v2, %v3085_v8  ;;  %v534_v54 = vsel %vm492_vm11, %v3085_v8, %v3045_v40  ;;  %v3926_v40 = vsel %vm282_vm0, %v257_v7, 0.0 }
  0xbb   : > { %v3094_v63 = vunpack.i.l.bf16 %v3904_v12  ;;  %2835 = vmatprep.subr.bf16.mxu1 %v3466_v16  ;;  %v1119_v37 = vsel %vm1114_vm2, %v3089_v34, %v3090_v18  ;;  %v429_v58 = vsel %vm387_vm10, %v3080_v28, %v3040_v10  ;;  %v1188_v0 = vpack.c.bf16 %v496_v55, %v391_v41 }
  0xbc   : > { %658 = vrot.lane.b32.xlu1 %v3797_v56, %s3468_s29  ;;  %v3098_v35 = vpop.permute.xlu0 %3097  ;;  %v1186_v30 = vpack.c.bf16 %v534_v54, %v429_v58  ;;  %v1213_v48 = vpack.c.bf16 %v1119_v37, %v1119_v37  ;;  %v3391_v29 = vpack.i.bf16 %v3801_v57, %v3926_v40 }
  0xbd   : > { %v1120_v50 = vsel %vm1114_vm2, %v3090_v18, %v3094_v63  ;;  %v3100_v9 = vunpack.i.h.bf16 %v3098_v35  ;;  %v3099_v14 = vunpack.i.l.bf16 %v3098_v35  ;;  %2836 = vmatpush3.bf16.msra.mxu1 %v1191_v49  ;;  %v1165_v36 = vsel %vm1114_vm2, %v3094_v63, %v3089_v34  ;;  %1462 = vmatpush1.bf16.msra.mxu0 %v1189_v62 }
  0xbe   : > { %v3103_v61 = vpop.permute.xlu1 %3102  ;;  %3377 = vrot.lane.b32.xlu0 %v3807_v11, %s3469_s30  ;;  %v1214_v21 = vpack.c.bf16 %v1120_v50, %v1120_v50  ;;  %1463 = vmatprep.subr.bf16.mxu0 %v1187_v13  ;;  %v1215_v8 = vpack.c.bf16 %v1165_v36, %v1165_v36  ;;  %v1570_v63 = vsel %vm282_vm0, %v1213_v48, 0  ;;  %v3406_v48 = vpack.i.bf16 %v3831_v39, %v3801_v57 }
  0xbf   : > { %v3105_v2 = vunpack.i.h.bf16 %v3103_v61  ;;  %v3104_v3 = vunpack.i.l.bf16 %v3103_v61  ;;  %2837 = vmatprep.subr.bf16.mxu1 %v3466_v16  ;;  %v910_v1 = vsel %vm904_vm3, %v3099_v14, %v3100_v9 }
  0xc0   : > { %3382 = vrot.lane.b32.xlu1 %v3807_v11, %s3470_s5  ;;  %v3931_v10 = vpop.permute.xlu0 %3107  ;;  %v3386_v11 = vpack.i.bf16 %v3926_v40, %v3831_v39  ;;  %v1576_v13 = vsel %vm282_vm0, %v1215_v8, 0 }
  0xc1   : > { %v3109_v17 = vunpack.i.l.bf16 %v3931_v10  ;;  %2838 = vmatpush3.bf16.msra.mxu1 %v1188_v0  ;;  %v1015_v18 = vsel %vm1009_vm4, %v3104_v3, %v3105_v2  ;;  %1464 = vmatpush1.bf16.msra.mxu0 %v1186_v30 }
  0xc2   : > { %v3936_v34 = vpop.permute.xlu1 %3112  ;;  %327 = vrot.lane.b32.xlu0 %v3797_v56, %s3469_s30  ;;  %2693 = vmatprep.subr.msk.bf16.mxu0 %vm282_vm0, %v1214_v21  ;;  %v1211_v28 = vpack.c.bf16 %v1015_v18, %v910_v1 }
  0xc3   : > { %v3114_v59 = vunpack.i.l.bf16 %v3936_v34  ;;  %2843 = vmatprep.subr.bf16.mxu1 %v3466_v16  ;;  %v909_v32 = vsel %vm904_vm3, %v3109_v17, %v3099_v14  ;;  %v955_v62 = vsel %vm904_vm3, %v3100_v9, %v3109_v17 }
  0xc4   : > { %448 = vrot.lane.b32.xlu1 %v3797_v56, %s3470_s5  ;;  %v3118_v49 = vpop.permute.xlu0 %3117  ;;  %2840 = vmatmul.mubr.msk.bf16.vlgmr.msra.gmra.mxu1 %vm1296_vm12, %v3845_v51 }
  0xc5   : > { %v1014_v41 = vsel %vm1009_vm4, %v3114_v59, %v3104_v3  ;;  %v1060_v55 = vsel %vm1009_vm4, %v3105_v2, %v3114_v59  ;;  %2688 = vmatmul.mubr.msk.bf16.vlgmr.msra.gmra.mxu0 %vm1296_vm12, %v3845_v51  ;;  %v3120_v54 = vunpack.i.h.bf16 %v3118_v49  ;;  %v3119_v35 = vunpack.i.l.bf16 %v3118_v49  ;;  %2844 = vmatpush3.bf16.msra.mxu1 %v1576_v13 }
  0xc6   : > { %v1210_v37 = vpack.c.bf16 %v1014_v41, %v909_v32  ;;  %v1212_v56 = vpack.c.bf16 %v1060_v55, %v955_v62  ;;  %1585 = vmatpush1.bf16.msra.mxu0 %v1570_v63  ;;  %v3959_v50 = vpop.permute.xlu1 %3122  ;;  %3387 = vrot.lane.b32.xlu0 %v3386_v11, %s3462_s24 }
  0xc7   : > { %v805_v9 = vsel %vm799_vm5, %v3119_v35, %v3120_v54  ;;  %1586 = vmatprep.subr.bf16.mxu0 %v1211_v28  ;;  %v3124_v14 = vunpack.i.l.bf16 %v3959_v50  ;;  %2845 = vmatprep.subr.bf16.mxu1 %v3466_v16 }
  0xc8   : > { %v2695_v36 = vpack.c.bf16 %v805_v9, %v3601_v25  ;;  %3392 = vrot.lane.b32.xlu1 %v3391_v29, %s3463_s25  ;;  %v3128_v58 = vpop.permute.xlu0 %3127  ;;  %1610 = vmatprep.mubr.bf16.mxu0 %v3471_v19 }
  0xc9   : > { %v804_v61 = vsel %vm799_vm5, %v3124_v14, %v3119_v35  ;;  %v850_v0 = vsel %vm799_vm5, %v3120_v54, %v3124_v14  ;;  %v3130_v21 = vunpack.i.h.bf16 %v3128_v58  ;;  %v3129_v2 = vunpack.i.l.bf16 %v3128_v58  ;;  %2846 = vmatpush3.bf16.msra.mxu1 %v1212_v56  ;;  %2853 = vmatprep.mubr.msk.bf16.mxu1 %vm3472_vm1, %v3466_v16 }
  0xca   : > { %v2698_v3 = vpack.c.bf16 %v804_v61, %v3592_v23  ;;  %v2702_v25 = vpack.c.bf16 %v850_v0, %v247_v26  ;;  %1587 = vmatpush1.bf16.msra.mxu0 %v1210_v37  ;;  %v3133_v30 = vpop.permute.xlu1 %3132  ;;  %3397 = vrot.lane.b32.xlu0 %v3391_v29, %s3464_s26  ;;  %v3095_v61 = vunpack.i.h.bf16 %v3904_v12 }
  0xcb   : > { %v3135_v8 = vunpack.i.h.bf16 %v3133_v30  ;;  %v3134_v1 = vunpack.i.l.bf16 %v3133_v30  ;;  %2696 = vmatprep.subr.msk.bf16.mxu0 %vm3741_vm7, %v2695_v36  ;;  %2847 = vmatprep.subr.bf16.mxu1 %v3466_v16  ;;  %v602_v17 = vsel %vm597_vm8, %v3129_v2, %v3130_v21 }
  0xcc   : > { %3402 = vrot.lane.b32.xlu1 %v3391_v29, %s3465_s27  ;;  %v3983_v22 = vpop.permute.xlu0 %3137 }
  0xcd   : > { %v3139_v23 = vunpack.i.l.bf16 %v3983_v22  ;;  %2848 = vmatpush3.bf16.msk.msra.mxu1 %vm3741_vm7, %v2702_v25  ;;  %v707_v26 = vsel %vm702_vm9, %v3134_v1, %v3135_v8 }
  0xce   : > { %2699 = vmatpush1.bf16.msk.msra.mxu0 %vm3741_vm7, %v2698_v3  ;;  %v3991_v57 = vpop.permute.xlu1 %3142  ;;  %3407 = vrot.lane.b32.xlu0 %v3406_v48, %s3467_s28  ;;  %v1205_v39 = vpack.c.bf16 %v707_v26, %v602_v17 }
  0xcf   : > { %v3144_v18 = vunpack.i.l.bf16 %v3991_v57  ;;  %2849 = vmatprep.subr.bf16.mxu1 %v3466_v16  ;;  %v603_v11 = vsel %vm597_vm8, %v3130_v21, %v3139_v23  ;;  %v640_v59 = vsel %vm597_vm8, %v3139_v23, %v3129_v2 }
  0xd0   : > { %3412 = vrot.lane.b32.xlu1 %v3406_v48, %s3468_s29  ;;  %v3148_v28 = vpop.permute.xlu0 %3147  ;;  %1590 = vmatprep.subr.bf16.mxu0 %v1205_v39 }
  0xd1   : > { %v708_v29 = vsel %vm702_vm9, %v3135_v8, %v3144_v18  ;;  %v745_v32 = vsel %vm702_vm9, %v3144_v18, %v3134_v1  ;;  %v3150_v62 = vunpack.i.h.bf16 %v3148_v28  ;;  %v3149_v49 = vunpack.i.l.bf16 %v3148_v28  ;;  %v231_v28 = vld [vmem:[%s4526_s2] sm:$0xff] }
  0xd2   : > { %v1204_v63 = vpack.c.bf16 %v745_v32, %v640_v59  ;;  %v1206_v13 = vpack.c.bf16 %v708_v29, %v603_v11  ;;  %v3153_v41 = vpop.permute.xlu1 %3152  ;;  %555 = vrot.lane.b32.xlu0 %v3926_v40, %s3467_s28 }
  0xd3   : > { %v3155_v55 = vunpack.i.h.bf16 %v3153_v41  ;;  %v3154_v54 = vunpack.i.l.bf16 %v3153_v41  ;;  %v392_v35 = vsel %vm387_vm10, %v3149_v49, %v3150_v62 }
  0xd4   : > { %660 = vrot.lane.b32.xlu1 %v3926_v40, %s3468_s29  ;;  %v4006_v37 = vpop.permute.xlu0 %3157  ;;  %1591 = vmatpush1.bf16.msra.mxu0 %v1204_v63  ;;  %v3115_v63 = vunpack.i.h.bf16 %v3936_v34 }
  0xd5   : > { %v3159_v56 = vunpack.i.l.bf16 %v4006_v37  ;;  %2850 = vmatpush3.bf16.msra.mxu1 %v1206_v13  ;;  %v497_v9 = vsel %vm492_vm11, %v3154_v54, %v3155_v55 }
  0xd6   : > { %v4010_v14 = vpop.permute.xlu1 %3162  ;;  %3417 = vrot.lane.b32.xlu0 %v3406_v48, %s3469_s30  ;;  %v1202_v36 = vpack.c.bf16 %v497_v9, %v392_v35  ;;  %2851 = vmatprep.subr.bf16.mxu1 %v3466_v16 }
  0xd7   : > { %v3164_v58 = vunpack.i.l.bf16 %v4010_v14  ;;  %v393_v0 = vsel %vm387_vm10, %v3150_v62, %v3159_v56  ;;  %v430_v21 = vsel %vm387_vm10, %v3159_v56, %v3149_v49  ;;  %v3110_v49 = vunpack.i.h.bf16 %v3931_v10 }
  0xd8   : > { %3422 = vrot.lane.b32.xlu1 %v3406_v48, %s3470_s5  ;;  %v3168_v2 = vpop.permute.xlu0 %3167  ;;  %1592 = vmatprep.subr.bf16.mxu0 %v1202_v36 }
  0xd9   : > { %v498_v3 = vsel %vm492_vm11, %v3155_v55, %v3164_v58  ;;  %v535_v25 = vsel %vm492_vm11, %v3164_v58, %v3154_v54  ;;  %v3170_v30 = vunpack.i.h.bf16 %v3168_v2  ;;  %v3169_v8 = vunpack.i.l.bf16 %v3168_v2 }
  0xda   : > { %v1201_v1 = vpack.c.bf16 %v535_v25, %v430_v21  ;;  %v1203_v17 = vpack.c.bf16 %v498_v3, %v393_v0  ;;  %v3173_v23 = vpop.permute.xlu1 %3172  ;;  %329 = vrot.lane.b32.xlu0 %v3926_v40, %s3469_s30  ;;  %v3125_v55 = vunpack.i.h.bf16 %v3959_v50  ;;  %v232_v50 = vld [vmem:[%s4526_s2 + $0x8] sm:$0xff] }
  0xdb   : > { %v1122_v12 = vsel %vm1114_vm2, %v3169_v8, %v3170_v30  ;;  %v1121_v26 = vsel %vm1114_vm2, %v3095_v61, %v3169_v8  ;;  %v3175_v48 = vunpack.i.h.bf16 %v3173_v23  ;;  %v1166_v59 = vsel %vm1114_vm2, %v3170_v30, %v3095_v61 }
  0xdc   : > { %v1229_v39 = vpack.c.bf16 %v1122_v12, %v1122_v12  ;;  %450 = vrot.lane.b32.xlu1 %v3926_v40, %s3470_s5  ;;  %v3178_v18 = vpop.permute.xlu0 %3177  ;;  %1593 = vmatpush1.bf16.msra.mxu0 %v1201_v1  ;;  %v1228_v11 = vpack.c.bf16 %v1121_v26, %v1121_v26  ;;  %v3174_v29 = vunpack.i.l.bf16 %v3173_v23  ;;  %v1230_v41 = vpack.c.bf16 %v1166_v59, %v1166_v59 }
  0xdd   : > { %v3180_v32 = vunpack.i.h.bf16 %v3178_v18  ;;  %v3179_v62 = vunpack.i.l.bf16 %v3178_v18  ;;  %2852 = vmatpush3.bf16.msra.mxu1 %v1203_v17  ;;  %v911_v10 = vsel %vm904_vm3, %v3175_v48, %v3110_v49  ;;  %v3145_v23 = vunpack.i.h.bf16 %v3991_v57 }
  0xde   : > { %v3183_v13 = vpop.permute.xlu1 %3182  ;;  %2705 = vmatprep.subr.msk.bf16.mxu0 %vm282_vm0, %v1229_v39  ;;  %2857 = vmatprep.subr.bf16.mxu1 %v3466_v16  ;;  %v1699_v40 = vsel %vm282_vm0, %v1228_v11, 0  ;;  %v1705_v9 = vsel %vm282_vm0, %v1230_v41, 0  ;;  %v956_v58 = vsel %vm904_vm3, %v3174_v29, %v3175_v48  ;;  %v912_v25 = vsel %vm904_vm3, %v3110_v49, %v3174_v29 }
  0xdf   : > { %v1061_v54 = vsel %vm1009_vm4, %v3179_v62, %v3180_v32  ;;  %v3185_v35 = vunpack.i.h.bf16 %v3183_v13  ;;  %v3184_v56 = vunpack.i.l.bf16 %v3183_v13  ;;  %2700 = vmatmul.mubr.msk.bf16.vlgmr.msra.gmra.mxu0 %vm1296_vm12, %v3845_v51  ;;  %1401 = vperm.xlu0 %3426, %v231_v28   ;;  %v1017_v36 = vsel %vm1009_vm4, %v3115_v63, %v3179_v62 }
  0xe0   : > { %2854 = vmatmul.mubr.msk.bf16.vlgmr.msra.gmra.mxu1 %vm1296_vm12, %v3845_v51  ;;  %v3188_v34 = vpop.permute.xlu0 %3187  ;;  %1714 = vmatpush1.bf16.msra.mxu0 %v1699_v40  ;;  %v1016_v61 = vsel %vm1009_vm4, %v3180_v32, %v3115_v63  ;;  %v1227_v21 = vpack.c.bf16 %v1061_v54, %v956_v58  ;;  %v1226_v17 = vpack.c.bf16 %v1017_v36, %v912_v25  ;;  %v3140_v18 = vunpack.i.h.bf16 %v3983_v22 }
  0xe1   : > { %v807_v0 = vsel %vm799_vm5, %v3125_v55, %v3184_v56  ;;  %2858 = vmatpush3.bf16.msra.mxu1 %v1705_v9  ;;  %1739 = vmatprep.mubr.bf16.mxu0 %v3471_v19  ;;  %v806_v2 = vsel %vm799_vm5, %v3185_v35, %v3125_v55  ;;  %v3189_v8 = vunpack.i.l.bf16 %v3188_v34  ;;  %v1225_v12 = vpack.c.bf16 %v1016_v61, %v911_v10 }
  0xe2   : > { %v3193_v3 = vpop.permute.xlu1 %3192  ;;  %2859 = vmatprep.subr.bf16.mxu1 %v3466_v16  ;;  %2867 = vmatprep.mubr.msk.bf16.mxu1 %vm3472_vm1, %v3466_v16  ;;  %v2707_v30 = vpack.c.bf16 %v807_v0, %v3622_v33  ;;  %v851_v26 = vsel %vm799_vm5, %v3184_v56, %v3185_v35  ;;  %v3160_v11 = vunpack.i.h.bf16 %v4006_v37  ;;  %v3190_v59 = vunpack.i.h.bf16 %v3188_v34 }
  0xe3   : > { %v3194_v1 = vunpack.i.l.bf16 %v3193_v3  ;;  %1406 = vperm.xlu1 %3427, %v232_v50   ;;  %v3195_v39 = vunpack.i.h.bf16 %v3193_v3  ;;  %1715 = vmatprep.subr.bf16.mxu0 %v1226_v17  ;;  %v3165_v33 = vunpack.i.h.bf16 %v4010_v14  ;;  %v2710_v28 = vpack.c.bf16 %v806_v2, %v3606_v27 }
  0xe4   : > { %v3198_v48 = vpop.permute.xlu0 %3197  ;;  %1716 = vmatpush1.bf16.msra.mxu0 %v1225_v12  ;;  %v2714_v62 = vpack.c.bf16 %v851_v26, %v249_v38  ;;  %v605_v22 = vsel %vm597_vm8, %v3189_v8, %v3190_v59  ;;  %v604_v14 = vsel %vm597_vm8, %v3140_v18, %v3189_v8  ;;  %v641_v24 = vsel %vm597_vm8, %v3190_v59, %v3140_v18 }
  0xe5   : > { %2860 = vmatpush3.bf16.msra.mxu1 %v1227_v21  ;;  %v3199_v29 = vunpack.i.l.bf16 %v3198_v48  ;;  %v709_v57 = vsel %vm702_vm9, %v3145_v23, %v3194_v1  ;;  %2708 = vmatprep.subr.msk.bf16.mxu0 %vm3741_vm7, %v2707_v30  ;;  %v710_v27 = vsel %vm702_vm9, %v3194_v1, %v3195_v39  ;;  %v746_v49 = vsel %vm702_vm9, %v3195_v39, %v3145_v23 }
  0xe6   : > { %v3203_v32 = vpop.permute.xlu1 %3202  ;;  %2861 = vmatprep.subr.bf16.mxu1 %v3466_v16  ;;  %v1220_v40 = vpack.c.bf16 %v709_v57, %v604_v14  ;;  %v3200_v38 = vunpack.i.h.bf16 %v3198_v48  ;;  %v1219_v10 = vpack.c.bf16 %v746_v49, %v641_v24  ;;  %v1221_v34 = vpack.c.bf16 %v710_v27, %v605_v22 }
  0xe7   : > { %v3204_v37 = vunpack.i.l.bf16 %v3203_v32  ;;  %v3205_v63 = vunpack.i.h.bf16 %v3203_v32  ;;  %v394_v35 = vsel %vm387_vm10, %v3160_v11, %v3199_v29 }
  0xe8   : > { %v3208_v13 = vpop.permute.xlu0 %3207  ;;  %2711 = vmatpush1.bf16.msk.msra.mxu0 %vm3741_vm7, %v2710_v28  ;;  %v395_v50 = vsel %vm387_vm10, %v3199_v29, %v3200_v38  ;;  %v431_v8 = vsel %vm387_vm10, %v3200_v38, %v3160_v11 }
  0xe9   : > { %v3210_v41 = vunpack.i.h.bf16 %v3208_v13  ;;  %v3209_v55 = vunpack.i.l.bf16 %v3208_v13  ;;  %2862 = vmatpush3.bf16.msk.msra.mxu1 %vm3741_vm7, %v2714_v62  ;;  %v499_v56 = vsel %vm492_vm11, %v3165_v33, %v3204_v37  ;;  %1719 = vmatprep.subr.bf16.mxu0 %v1220_v40  ;;  %v500_v58 = vsel %vm492_vm11, %v3204_v37, %v3205_v63 }
  0xea   : > { %v4079_v54 = vpop.permute.xlu1 %3212  ;;  %2863 = vmatprep.subr.bf16.mxu1 %v3466_v16  ;;  %v1217_v36 = vpack.c.bf16 %v499_v56, %v394_v35  ;;  %v536_v61 = vsel %vm492_vm11, %v3205_v63, %v3165_v33  ;;  %v1218_v17 = vpack.c.bf16 %v500_v58, %v395_v50 }
  0xeb   : > { %v3214_v9 = vunpack.i.l.bf16 %v4079_v54  ;;  %v1123_v21 = vsel %vm1114_vm2, %v3209_v55, %v3210_v41  ;;  %v1216_v39 = vpack.c.bf16 %v536_v61, %v431_v8 }
  0xec   : > { %v3218_v0 = vpop.permute.xlu0 %3217  ;;  %1720 = vmatpush1.bf16.msra.mxu0 %v1219_v10  ;;  %v1243_v18 = vpack.c.bf16 %v1123_v21, %v1123_v21 }
  0xed   : > { %v1124_v2 = vsel %vm1114_vm2, %v3210_v41, %v3214_v9  ;;  %v3220_v3 = vunpack.i.h.bf16 %v3218_v0  ;;  %v3219_v25 = vunpack.i.l.bf16 %v3218_v0  ;;  %2864 = vmatpush3.bf16.msra.mxu1 %v1221_v34  ;;  %v1167_v30 = vsel %vm1114_vm2, %v3214_v9, %v3209_v55  ;;  %1721 = vmatprep.subr.bf16.mxu0 %v1217_v36 }
  0xee   : > { %v3223_v1 = vpop.permute.xlu1 %3222  ;;  %2865 = vmatprep.subr.bf16.mxu1 %v3466_v16  ;;  %v1244_v23 = vpack.c.bf16 %v1124_v2, %v1124_v2  ;;  %v1245_v59 = vpack.c.bf16 %v1167_v30, %v1167_v30  ;;  %v1828_v14 = vsel %vm282_vm0, %v1243_v18, 0 }
  0xef   : > { %v3225_v12 = vunpack.i.h.bf16 %v3223_v1  ;;  %v3224_v26 = vunpack.i.l.bf16 %v3223_v1  ;;  %v914_v33 = vsel %vm904_vm3, %v3219_v25, %v3220_v3 }
  0xf0   : > { %v4093_v48 = vpop.permute.xlu0 %3227  ;;  %1722 = vmatpush1.bf16.msra.mxu0 %v1216_v39  ;;  %v1834_v27 = vsel %vm282_vm0, %v1245_v59, 0 }
  0xf1   : > { %v3229_v28 = vunpack.i.l.bf16 %v4093_v48  ;;  %2866 = vmatpush3.bf16.msra.mxu1 %v1218_v17  ;;  %v1019_v11 = vsel %vm1009_vm4, %v3224_v26, %v3225_v12  ;;  %2717 = vmatprep.subr.msk.bf16.mxu0 %vm282_vm0, %v1244_v23 }
  0xf2   : > { %v4098_v29 = vpop.permute.xlu1 %3232  ;;  %2871 = vmatprep.subr.bf16.mxu1 %v3466_v16  ;;  %v1241_v57 = vpack.c.bf16 %v1019_v11, %v914_v33 }
  0xf3   : > { %v3234_v32 = vunpack.i.l.bf16 %v4098_v29  ;;  %v913_v62 = vsel %vm904_vm3, %v3229_v28, %v3219_v25  ;;  %v957_v22 = vsel %vm904_vm3, %v3220_v3, %v3229_v28  ;;  %2712 = vmatmul.mubr.msk.bf16.vlgmr.msra.gmra.mxu0 %vm1296_vm12, %v3845_v51 }
  0xf4   : > { %2868 = vmatmul.mubr.msk.bf16.vlgmr.msra.gmra.mxu1 %vm1296_vm12, %v3845_v51  ;;  %v3238_v37 = vpop.permute.xlu0 %3237  ;;  %1843 = vmatpush1.bf16.msra.mxu0 %v1828_v14 }
  0xf5   : > { %v1018_v49 = vsel %vm1009_vm4, %v3234_v32, %v3224_v26  ;;  %v1062_v63 = vsel %vm1009_vm4, %v3225_v12, %v3234_v32  ;;  %v3240_v13 = vunpack.i.h.bf16 %v3238_v37  ;;  %v3239_v40 = vunpack.i.l.bf16 %v3238_v37  ;;  %2872 = vmatpush3.bf16.msra.mxu1 %v1834_v27  ;;  %1844 = vmatprep.subr.bf16.mxu0 %v1241_v57 }
  0xf6   : > { %v1240_v41 = vpack.c.bf16 %v1018_v49, %v913_v62  ;;  %v1242_v55 = vpack.c.bf16 %v1062_v63, %v957_v22  ;;  %v4113_v24 = vpop.permute.xlu1 %3242  ;;  %2873 = vmatprep.subr.bf16.mxu1 %v3466_v16  ;;  %1868 = vmatprep.mubr.bf16.mxu0 %v3471_v19  ;;  %v3215_v49 = vunpack.i.h.bf16 %v4079_v54 }
  0xf7   : > { %v809_v38 = vsel %vm799_vm5, %v3239_v40, %v3240_v13  ;;  %v3244_v35 = vunpack.i.l.bf16 %v4113_v24  ;;  %2881 = vmatprep.mubr.msk.bf16.mxu1 %vm3472_vm1, %v3466_v16 }
  0xf8   : > { %v2719_v56 = vpack.c.bf16 %v809_v38, %v3661_v45  ;;  %v3248_v10 = vpop.permute.xlu0 %3247  ;;  %1845 = vmatpush1.bf16.msra.mxu0 %v1240_v41 }
  0xf9   : > { %v808_v34 = vsel %vm799_vm5, %v3244_v35, %v3239_v40  ;;  %v852_v9 = vsel %vm799_vm5, %v3240_v13, %v3244_v35  ;;  %v3250_v36 = vunpack.i.h.bf16 %v3248_v10  ;;  %v3249_v50 = vunpack.i.l.bf16 %v3248_v10  ;;  %2874 = vmatpush3.bf16.msra.mxu1 %v1242_v55 }
  0xfa   : > { %v2722_v58 = vpack.c.bf16 %v808_v34, %v3652_v43  ;;  %v2726_v61 = vpack.c.bf16 %v852_v9, %v251_v46  ;;  %v3253_v0 = vpop.permute.xlu1 %3252  ;;  %2875 = vmatprep.subr.bf16.mxu1 %v3466_v16  ;;  %2720 = vmatprep.subr.msk.bf16.mxu0 %vm3741_vm7, %v2719_v56 }
  0xfb   : > { %v3255_v45 = vunpack.i.h.bf16 %v3253_v0  ;;  %v3254_v21 = vunpack.i.l.bf16 %v3253_v0  ;;  %v606_v2 = vsel %vm597_vm8, %v3249_v50, %v3250_v36 }
  0xfc   : > { %v4131_v3 = vpop.permute.xlu0 %3257  ;;  %2723 = vmatpush1.bf16.msk.msra.mxu0 %vm3741_vm7, %v2722_v58 }
  0xfd   : > { %v3259_v25 = vunpack.i.l.bf16 %v4131_v3  ;;  %2876 = vmatpush3.bf16.msk.msra.mxu1 %vm3741_vm7, %v2726_v61  ;;  %v711_v42 = vsel %vm702_vm9, %v3254_v21, %v3255_v45 }
  0xfe   : > { %v4139_v43 = vpop.permute.xlu1 %3262  ;;  %v1235_v46 = vpack.c.bf16 %v711_v42, %v606_v2  ;;  %2877 = vmatprep.subr.bf16.mxu1 %v3466_v16 }
  0xff   : > { %v3264_v30 = vunpack.i.l.bf16 %v4139_v43  ;;  %v607_v8 = vsel %vm597_vm8, %v3250_v36, %v3259_v25  ;;  %v642_v1 = vsel %vm597_vm8, %v3259_v25, %v3249_v50  ;;  %v3235_v25 = vunpack.i.h.bf16 %v4098_v29 }
 0x100   : > { %v3268_v17 = vpop.permute.xlu0 %3267  ;;  %1848 = vmatprep.subr.bf16.mxu0 %v1235_v46  ;;  %v3230_v29 = vunpack.i.h.bf16 %v4093_v48 }
 0x101   : > { %v712_v23 = vsel %vm702_vm9, %v3255_v45, %v3264_v30  ;;  %v747_v12 = vsel %vm702_vm9, %v3264_v30, %v3254_v21  ;;  %v3270_v26 = vunpack.i.h.bf16 %v3268_v17  ;;  %v3269_v39 = vunpack.i.l.bf16 %v3268_v17 }
 0x102   : > { %v1234_v18 = vpack.c.bf16 %v747_v12, %v642_v1  ;;  %v1236_v59 = vpack.c.bf16 %v712_v23, %v607_v8  ;;  %v3273_v33 = vpop.permute.xlu1 %3272  ;;  %v3245_v8 = vunpack.i.h.bf16 %v4113_v24 }
 0x103   : > { %v3275_v28 = vunpack.i.h.bf16 %v3273_v33  ;;  %v3274_v11 = vunpack.i.l.bf16 %v3273_v33  ;;  %v396_v32 = vsel %vm387_vm10, %v3269_v39, %v3270_v26 }
 0x104   : > { %v4148_v57 = vpop.permute.xlu0 %3277  ;;  %1849 = vmatpush1.bf16.msra.mxu0 %v1234_v18  ;;  %2878 = vmatpush3.bf16.msra.mxu1 %v1236_v59 }
 0x105   : > { %v3279_v62 = vunpack.i.l.bf16 %v4148_v57  ;;  %v501_v22 = vsel %vm492_vm11, %v3274_v11, %v3275_v28  ;;  %2879 = vmatprep.subr.bf16.mxu1 %v3466_v16 }
 0x106   : > { %v4153_v37 = vpop.permute.xlu1 %3282  ;;  %v1232_v14 = vpack.c.bf16 %v501_v22, %v396_v32 }
 0x107   : > { %v3284_v27 = vunpack.i.l.bf16 %v4153_v37  ;;  %v397_v63 = vsel %vm387_vm10, %v3270_v26, %v3279_v62  ;;  %v432_v13 = vsel %vm387_vm10, %v3279_v62, %v3269_v39 }
 0x108   : > { %v3288_v40 = vpop.permute.xlu0 %3287  ;;  %1850 = vmatprep.subr.bf16.mxu0 %v1232_v14 }
 0x109   : > { %v502_v41 = vsel %vm492_vm11, %v3275_v28, %v3284_v27  ;;  %v537_v55 = vsel %vm492_vm11, %v3284_v27, %v3274_v11  ;;  %v3290_v38 = vunpack.i.h.bf16 %v3288_v40  ;;  %v3289_v35 = vunpack.i.l.bf16 %v3288_v40 }
 0x10a   : > { %v1231_v56 = vpack.c.bf16 %v537_v55, %v432_v13  ;;  %v1233_v10 = vpack.c.bf16 %v502_v41, %v397_v63  ;;  %v3293_v34 = vpop.permute.xlu1 %3292  ;;  %v3265_v27 = vunpack.i.h.bf16 %v4139_v43  ;;  %v3260_v41 = vunpack.i.h.bf16 %v4131_v3 }
 0x10b   : > { %v1126_v9 = vsel %vm1114_vm2, %v3289_v35, %v3290_v38  ;;  %v1125_v36 = vsel %vm1114_vm2, %v3215_v49, %v3289_v35  ;;  %v1168_v61 = vsel %vm1114_vm2, %v3290_v38, %v3215_v49  ;;  %v3295_v0 = vunpack.i.h.bf16 %v3293_v34 }
 0x10c   : > { %v1259_v54 = vpack.c.bf16 %v1126_v9, %v1126_v9  ;;  %v3298_v50 = vpop.permute.xlu0 %3297  ;;  %1851 = vmatpush1.bf16.msra.mxu0 %v1231_v56  ;;  %2880 = vmatpush3.bf16.msra.mxu1 %v1233_v10  ;;  %v1258_v58 = vpack.c.bf16 %v1125_v36, %v1125_v36  ;;  %v3294_v45 = vunpack.i.l.bf16 %v3293_v34  ;;  %v1260_v30 = vpack.c.bf16 %v1168_v61, %v1168_v61 }
 0x10d   : > { %v3300_v21 = vunpack.i.h.bf16 %v3298_v50  ;;  %v3299_v2 = vunpack.i.l.bf16 %v3298_v50  ;;  %2885 = vmatprep.subr.bf16.mxu1 %v3466_v16  ;;  %v3280_v55 = vunpack.i.h.bf16 %v4148_v57  ;;  %v3285_v35 = vunpack.i.h.bf16 %v4153_v37 }
 0x10e   : > { %v3303_v42 = vpop.permute.xlu1 %3302  ;;  %2729 = vmatprep.subr.msk.bf16.mxu0 %vm282_vm0, %v1259_v54  ;;  %v1957_v46 = vsel %vm282_vm0, %v1258_v58, 0  ;;  %v1963_v26 = vsel %vm282_vm0, %v1260_v30, 0  ;;  %v958_v24 = vsel %vm904_vm3, %v3294_v45, %v3295_v0  ;;  %v916_v11 = vsel %vm904_vm3, %v3230_v29, %v3294_v45 }
 0x10f   : > { %v1063_v1 = vsel %vm1009_vm4, %v3299_v2, %v3300_v21  ;;  %v3305_v17 = vunpack.i.h.bf16 %v3303_v42  ;;  %v3304_v23 = vunpack.i.l.bf16 %v3303_v42  ;;  %2724 = vmatmul.mubr.msk.bf16.vlgmr.msra.gmra.mxu0 %vm1296_vm12, %v3845_v51  ;;  %2882 = vmatmul.mubr.msk.bf16.vlgmr.msra.gmra.mxu1 %vm1296_vm12, %v3845_v51  ;;  %v1021_v39 = vsel %vm1009_vm4, %v3235_v25, %v3299_v2 }
 0x110   : > { %v3308_v12 = vpop.permute.xlu0 %3307  ;;  %1972 = vmatpush1.bf16.msra.mxu0 %v1957_v46  ;;  %1997 = vmatprep.mubr.bf16.mxu0 %v3471_v19  ;;  %v1020_v18 = vsel %vm1009_vm4, %v3300_v21, %v3235_v25  ;;  %v915_v51 = vsel %vm904_vm3, %v3295_v0, %v3230_v29  ;;  %v1257_v48 = vpack.c.bf16 %v1063_v1, %v958_v24 }
 0x111   : > { %v811_v59 = vsel %vm799_vm5, %v3245_v8, %v3304_v23  ;;  %2886 = vmatpush3.bf16.msra.mxu1 %v1963_v26  ;;  %2895 = vmatprep.mubr.msk.bf16.mxu1 %vm3472_vm1, %v3466_v16  ;;  %v810_v33 = vsel %vm799_vm5, %v3305_v17, %v3245_v8  ;;  %v3309_v62 = vunpack.i.l.bf16 %v3308_v12  ;;  %v1256_v14 = vpack.c.bf16 %v1021_v39, %v916_v11 }
 0x112   : > { %v3313_v28 = vpop.permute.xlu1 %3312  ;;  %2887 = vmatprep.subr.bf16.mxu1 %v3466_v16  ;;  %v2731_v32 = vpack.c.bf16 %v811_v59, %v3682_v53  ;;  %v1255_v49 = vpack.c.bf16 %v1020_v18, %v915_v51  ;;  %v853_v63 = vsel %vm799_vm5, %v3304_v23, %v3305_v17  ;;  %v3310_v38 = vunpack.i.h.bf16 %v3308_v12 }
 0x113   : > { %v3314_v22 = vunpack.i.l.bf16 %v3313_v28  ;;  %v3315_v13 = vunpack.i.h.bf16 %v3313_v28  ;;  %1973 = vmatprep.subr.bf16.mxu0 %v1256_v14  ;;  %v2734_v53 = vpack.c.bf16 %v810_v33, %v3666_v47  ;;  %v2738_v34 = vpack.c.bf16 %v853_v63, %v253_v60 }
 0x114   : > { %v3318_v40 = vpop.permute.xlu0 %3317  ;;  %1974 = vmatpush1.bf16.msra.mxu0 %v1255_v49  ;;  %v609_v3 = vsel %vm597_vm8, %v3309_v62, %v3310_v38  ;;  %v608_v37 = vsel %vm597_vm8, %v3260_v41, %v3309_v62  ;;  %v643_v44 = vsel %vm597_vm8, %v3310_v38, %v3260_v41 }
 0x115   : > { %2888 = vmatpush3.bf16.msra.mxu1 %v1257_v48  ;;  %v3319_v56 = vunpack.i.l.bf16 %v3318_v40  ;;  %v713_v43 = vsel %vm702_vm9, %v3265_v27, %v3314_v22  ;;  %2732 = vmatprep.subr.msk.bf16.mxu0 %vm3741_vm7, %v2731_v32  ;;  %v714_v47 = vsel %vm702_vm9, %v3314_v22, %v3315_v13  ;;  %v748_v9 = vsel %vm702_vm9, %v3315_v13, %v3265_v27 }
 0x116   : > { %v3323_v10 = vpop.permute.xlu1 %3322  ;;  %2889 = vmatprep.subr.bf16.mxu1 %v3466_v16  ;;  %v1250_v50 = vpack.c.bf16 %v713_v43, %v608_v37  ;;  %v3320_v60 = vunpack.i.h.bf16 %v3318_v40  ;;  %v1249_v2 = vpack.c.bf16 %v748_v9, %v643_v44  ;;  %v1251_v25 = vpack.c.bf16 %v714_v47, %v609_v3 }
 0x117   : > { %v3324_v57 = vunpack.i.l.bf16 %v3323_v10  ;;  %v3325_v36 = vunpack.i.h.bf16 %v3323_v10  ;;  %v398_v45 = vsel %vm387_vm10, %v3280_v55, %v3319_v56 }
 0x118   : > { %v3328_v54 = vpop.permute.xlu0 %3327  ;;  %2735 = vmatpush1.bf16.msk.msra.mxu0 %vm3741_vm7, %v2734_v53  ;;  %v399_v30 = vsel %vm387_vm10, %v3319_v56, %v3320_v60  ;;  %v433_v24 = vsel %vm387_vm10, %v3320_v60, %v3280_v55  ;;  %v4238_v55 = vld [vmem:[%s4525_s1] sm:$0xff]  }
 0x119   : > { %v3330_v58 = vunpack.i.h.bf16 %v3328_v54  ;;  %v3329_v61 = vunpack.i.l.bf16 %v3328_v54  ;;  %2890 = vmatpush3.bf16.msk.msra.mxu1 %vm3741_vm7, %v2738_v34  ;;  %v503_v21 = vsel %vm492_vm11, %v3285_v35, %v3324_v57  ;;  %1977 = vmatprep.subr.bf16.mxu0 %v1250_v50  ;;  %v504_v8 = vsel %vm492_vm11, %v3324_v57, %v3325_v36 }
 0x11a   : > { %v4209_v0 = vpop.permute.xlu1 %3332  ;;  %2891 = vmatprep.subr.bf16.mxu1 %v3466_v16  ;;  %v1247_v46 = vpack.c.bf16 %v503_v21, %v398_v45  ;;  %v538_v1 = vsel %vm492_vm11, %v3325_v36, %v3285_v35  ;;  %v1248_v59 = vpack.c.bf16 %v504_v8, %v399_v30  ;;  %v4532_v45 = vunpack.c.h.bf16 %v3729_v52 }
 0x11b   : > { %v3334_v42 = vunpack.i.l.bf16 %v4209_v0  ;;  %v1127_v23 = vsel %vm1114_vm2, %v3329_v61, %v3330_v58  ;;  %v1246_v28 = vpack.c.bf16 %v538_v1, %v433_v24 }
 0x11c   : > { %v3338_v17 = vpop.permute.xlu0 %3337  ;;  %1978 = vmatpush1.bf16.msra.mxu0 %v1249_v2  ;;  %v1273_v32 = vpack.c.bf16 %v1127_v23, %v1127_v23 }
 0x11d   : > { %v1128_v29 = vsel %vm1114_vm2, %v3330_v58, %v3334_v42  ;;  %v3340_v12 = vunpack.i.h.bf16 %v3338_v17  ;;  %v3339_v26 = vunpack.i.l.bf16 %v3338_v17  ;;  %2892 = vmatpush3.bf16.msra.mxu1 %v1251_v25  ;;  %v1169_v39 = vsel %vm1114_vm2, %v3334_v42, %v3329_v61  ;;  %1979 = vmatprep.subr.bf16.mxu0 %v1247_v46 }
 0x11e   : > { %v3343_v18 = vpop.permute.xlu1 %3342  ;;  %2893 = vmatprep.subr.bf16.mxu1 %v3466_v16  ;;  %v1274_v51 = vpack.c.bf16 %v1128_v29, %v1128_v29  ;;  %v1275_v62 = vpack.c.bf16 %v1169_v39, %v1169_v39  ;;  %v2086_v35 = vsel %vm282_vm0, %v1273_v32, 0 }
 0x11f   : > { %v3345_v48 = vunpack.i.h.bf16 %v3343_v18  ;;  %v3344_v33 = vunpack.i.l.bf16 %v3343_v18  ;;  %v918_v22 = vsel %vm904_vm3, %v3339_v26, %v3340_v12 }
 0x120   : > { %v4223_v11 = vpop.permute.xlu0 %3347  ;;  %1980 = vmatpush1.bf16.msra.mxu0 %v1246_v28  ;;  %v2092_v53 = vsel %vm282_vm0, %v1275_v62, 0 }
 0x121   : > { %v3349_v14 = vunpack.i.l.bf16 %v4223_v11  ;;  %2894 = vmatpush3.bf16.msra.mxu1 %v1248_v59  ;;  %v1023_v27 = vsel %vm1009_vm4, %v3344_v33, %v3345_v48  ;;  %2741 = vmatprep.subr.msk.bf16.mxu0 %vm282_vm0, %v1274_v51 }
 0x122   : > { %v4228_v49 = vpop.permute.xlu1 %3352  ;;  %2899 = vmatprep.subr.bf16.mxu1 %v3466_v16  ;;  %v1271_v13 = vpack.c.bf16 %v1023_v27, %v918_v22 }
 0x123   : > { %v3354_v63 = vunpack.i.l.bf16 %v4228_v49  ;;  %v917_v40 = vsel %vm904_vm3, %v3349_v14, %v3339_v26  ;;  %v959_v41 = vsel %vm904_vm3, %v3340_v12, %v3349_v14  ;;  %2736 = vmatmul.mubr.msk.bf16.vlgmr.msra.gmra.mxu0 %vm1296_vm12, %v4238_v55 }
 0x124   : > { %2896 = vmatmul.mubr.msk.bf16.vlgmr.msra.gmra.mxu1 %vm1296_vm12, %v4238_v55  ;;  %v3358_v38 = vpop.permute.xlu0 %3357  ;;  %2101 = vmatpush1.bf16.msra.mxu0 %v2086_v35 }
 0x125   : > { %v1022_v56 = vsel %vm1009_vm4, %v3354_v63, %v3344_v33  ;;  %v1064_v10 = vsel %vm1009_vm4, %v3345_v48, %v3354_v63  ;;  %v3360_v43 = vunpack.i.h.bf16 %v3358_v38  ;;  %v3359_v34 = vunpack.i.l.bf16 %v3358_v38  ;;  %2900 = vmatpush3.bf16.msra.mxu1 %v2092_v53  ;;  %2102 = vmatprep.subr.bf16.mxu0 %v1271_v13 }
 0x126   : > { %v1270_v3 = vpack.c.bf16 %v1022_v56, %v917_v40  ;;  %v1272_v57 = vpack.c.bf16 %v1064_v10, %v959_v41  ;;  %v4248_v37 = vpop.permute.xlu1 %3362  ;;  %2901 = vmatprep.subr.bf16.mxu1 %v3466_v16  ;;  %2126 = vmatprep.mubr.bf16.mxu0 %v3471_v19  ;;  %v3335_v38 = vunpack.i.h.bf16 %v4209_v0  ;;  %v3355_v0 = vunpack.i.h.bf16 %v4228_v49 }
 0x127   : > { %v813_v47 = vsel %vm799_vm5, %v3359_v34, %v3360_v43  ;;  %v3364_v9 = vunpack.i.l.bf16 %v4248_v37  ;;  %2909 = vmatprep.mubr.msk.bf16.mxu1 %vm3472_vm1, %v3466_v16  ;;  %v3365_v49 = vunpack.i.h.bf16 %v4248_v37 }
 0x128   : > { %v2743_v36 = vpack.c.bf16 %v813_v47, %v3765_v31  ;;  %v3368_v54 = vpop.permute.xlu0 %3367  ;;  %2103 = vmatpush1.bf16.msra.mxu0 %v1270_v3 }
 0x129   : > { %v812_v50 = vsel %vm799_vm5, %v3364_v9, %v3359_v34  ;;  %v854_v58 = vsel %vm799_vm5, %v3360_v43, %v3364_v9  ;;  %v3370_v61 = vunpack.i.h.bf16 %v3368_v54  ;;  %v3369_v44 = vunpack.i.l.bf16 %v3368_v54  ;;  %2902 = vmatpush3.bf16.msra.mxu1 %v1272_v57 }
 0x12a   : > { %v2746_v60 = vpack.c.bf16 %v812_v50, %v3746_v6  ;;  %v2750_v21 = vpack.c.bf16 %v854_v58, %v4532_v45  ;;  %v3373_v2 = vpop.permute.xlu1 %3372  ;;  %2903 = vmatprep.subr.bf16.mxu1 %v3466_v16  ;;  %2744 = vmatprep.subr.msk.bf16.mxu0 %vm3741_vm7, %v2743_v36  ;;  %v3350_v58 = vunpack.i.h.bf16 %v4223_v11 }
 0x12b   : > { %v3375_v31 = vunpack.i.h.bf16 %v3373_v2  ;;  %v3374_v25 = vunpack.i.l.bf16 %v3373_v2  ;;  %v610_v42 = vsel %vm597_vm8, %v3369_v44, %v3370_v61 }
 0x12c   : > { %v554_v46 = vpop.permute.xlu0 %553  ;;  %2747 = vmatpush1.bf16.msk.msra.mxu0 %vm3741_vm7, %v2746_v60 }
 0x12d   : > { %2904 = vmatpush3.bf16.msk.msra.mxu1 %vm3741_vm7, %v2750_v21  ;;  %v715_v6 = vsel %vm702_vm9, %v3374_v25, %v3375_v31  ;;  %v611_v8 = vsel %vm597_vm8, %v3370_v61, %v554_v46  ;;  %v644_v1 = vsel %vm597_vm8, %v554_v46, %v3369_v44 }
 0x12e   : > { %v659_v52 = vpop.permute.xlu1 %658  ;;  %v1265_v30 = vpack.c.bf16 %v715_v6, %v610_v42  ;;  %2905 = vmatprep.subr.bf16.mxu1 %v3466_v16 }
 0x12f   : > { %v716_v17 = vsel %vm702_vm9, %v3375_v31, %v659_v52  ;;  %v749_v23 = vsel %vm702_vm9, %v659_v52, %v3374_v25 }
 0x130   : > { %v1264_v29 = vpack.c.bf16 %v749_v23, %v644_v1  ;;  %v1266_v12 = vpack.c.bf16 %v716_v17, %v611_v8  ;;  %v3378_v26 = vpop.permute.xlu0 %3377  ;;  %2106 = vmatprep.subr.bf16.mxu0 %v1265_v30 }
 0x131   : > { %v3380_v39 = vunpack.i.h.bf16 %v3378_v26  ;;  %v3379_v24 = vunpack.i.l.bf16 %v3378_v26 }
 0x132   : > { %v3383_v18 = vpop.permute.xlu1 %3382  ;;  %2107 = vmatpush1.bf16.msra.mxu0 %v1264_v29  ;;  %2906 = vmatpush3.bf16.msra.mxu1 %v1266_v12 }
 0x133   : > { %v3385_v59 = vunpack.i.h.bf16 %v3383_v18  ;;  %v3384_v51 = vunpack.i.l.bf16 %v3383_v18  ;;  %v400_v48 = vsel %vm387_vm10, %v3379_v24, %v3380_v39  ;;  %2907 = vmatprep.subr.bf16.mxu1 %v3466_v16 }
 0x134   : > { %v328_v33 = vpop.permute.xlu0 %327 }
 0x135   : > { %v505_v28 = vsel %vm492_vm11, %v3384_v51, %v3385_v59  ;;  %v401_v22 = vsel %vm387_vm10, %v3380_v39, %v328_v33  ;;  %v434_v14 = vsel %vm387_vm10, %v328_v33, %v3379_v24 }
 0x136   : > { %v449_v32 = vpop.permute.xlu1 %448  ;;  %v1262_v62 = vpack.c.bf16 %v505_v28, %v400_v48 }
 0x137   : > { %v506_v27 = vsel %vm492_vm11, %v3385_v59, %v449_v32  ;;  %v539_v63 = vsel %vm492_vm11, %v449_v32, %v3384_v51 }
 0x138   : > { %v1261_v13 = vpack.c.bf16 %v539_v63, %v434_v14  ;;  %v1263_v40 = vpack.c.bf16 %v506_v27, %v401_v22  ;;  %v3388_v41 = vpop.permute.xlu0 %3387  ;;  %2108 = vmatprep.subr.bf16.mxu0 %v1262_v62 }
 0x139   : > { %v3390_v35 = vunpack.i.h.bf16 %v3388_v41  ;;  %v3389_v53 = vunpack.i.l.bf16 %v3388_v41 }
 0x13a   : > { %v3393_v56 = vpop.permute.xlu1 %3392  ;;  %2109 = vmatpush1.bf16.msra.mxu0 %v1261_v13  ;;  %2908 = vmatpush3.bf16.msra.mxu1 %v1263_v40 }
 0x13b   : > { %v1130_v10 = vsel %vm1114_vm2, %v3389_v53, %v3390_v35  ;;  %v3395_v43 = vunpack.i.h.bf16 %v3393_v56  ;;  %2913 = vmatprep.subr.bf16.mxu1 %v3466_v16  ;;  %v1129_v34 = vsel %vm1114_vm2, %v3335_v38, %v3389_v53  ;;  %v3394_v57 = vunpack.i.l.bf16 %v3393_v56 }
 0x13c   : > { %v1289_v3 = vpack.c.bf16 %v1130_v10, %v1130_v10  ;;  %v3398_v47 = vpop.permute.xlu0 %3397  ;;  %v1288_v9 = vpack.c.bf16 %v1129_v34, %v1129_v34  ;;  %v1170_v36 = vsel %vm1114_vm2, %v3390_v35, %v3335_v38  ;;  %vm2362_vm2 = vcmask 1045504  }
 0x13d   : > { %v3400_v54 = vunpack.i.h.bf16 %v3398_v47  ;;  %v3399_v50 = vunpack.i.l.bf16 %v3398_v47  ;;  %2748 = vmatmul.mubr.msk.bf16.vlgmr.msra.gmra.mxu0 %vm1296_vm12, %v4238_v55  ;;  %2910 = vmatmul.mubr.msk.bf16.vlgmr.msra.gmra.mxu1 %vm1296_vm12, %v4238_v55  ;;  %v1290_v60 = vpack.c.bf16 %v1170_v36, %v1170_v36  ;;  %v960_v11 = vsel %vm904_vm3, %v3394_v57, %v3395_v43 }
 0x13e   : > { %v3403_v61 = vpop.permute.xlu1 %3402  ;;  %2753 = vmatprep.subr.msk.bf16.mxu0 %vm282_vm0, %v1289_v3  ;;  %v2215_v44 = vsel %vm282_vm0, %v1288_v9, 0  ;;  %2255 = vmatprep.mubr.bf16.mxu0 %v3471_v19  ;;  %v919_v19 = vsel %vm904_vm3, %v3395_v43, %v3350_v58  ;;  %v920_v17 = vsel %vm904_vm3, %v3350_v58, %v3394_v57  ;;  %vm2366_vm3 = vcmask 1046528  }
 0x13f   : > { %v1024_v45 = vsel %vm1009_vm4, %v3400_v54, %v3355_v0  ;;  %v1065_v21 = vsel %vm1009_vm4, %v3399_v50, %v3400_v54  ;;  %v3404_v2 = vunpack.i.l.bf16 %v3403_v61  ;;  %2230 = vmatpush1.bf16.msra.mxu0 %v2215_v44  ;;  %2923 = vmatprep.mubr.msk.bf16.mxu1 %vm3472_vm1, %v3466_v16  ;;  %v3405_v31 = vunpack.i.h.bf16 %v3403_v61 }
 0x140   : > { %v2221_v25 = vsel %vm282_vm0, %v1290_v60, 0  ;;  %v3408_v42 = vpop.permute.xlu0 %3407  ;;  %v1025_v46 = vsel %vm1009_vm4, %v3355_v0, %v3399_v50  ;;  %v1287_v37 = vpack.c.bf16 %v1065_v21, %v960_v11  ;;  %v1285_v30 = vpack.c.bf16 %v1024_v45, %v919_v19 }
 0x141   : > { %v815_v6 = vsel %vm799_vm5, %v3365_v49, %v3404_v2  ;;  %2914 = vmatpush3.bf16.msra.mxu1 %v2221_v25  ;;  %v3410_v52 = vunpack.i.h.bf16 %v3408_v42  ;;  %v3409_v8 = vunpack.i.l.bf16 %v3408_v42  ;;  %v1286_v26 = vpack.c.bf16 %v1025_v46, %v920_v17 }
 0x142   : > { %v3413_v1 = vpop.permute.xlu1 %3412  ;;  %2915 = vmatprep.subr.bf16.mxu1 %v3466_v16  ;;  %v2755_v23 = vpack.c.bf16 %v815_v6, %v3812_v20  ;;  %v855_v39 = vsel %vm799_vm5, %v3404_v2, %v3405_v31  ;;  %v814_v59 = vsel %vm799_vm5, %v3405_v31, %v3365_v49  ;;  %vm2358_vm1 = vcmask 1044480  }
 0x143   : > { %v3415_v29 = vunpack.i.h.bf16 %v3413_v1  ;;  %v3414_v12 = vunpack.i.l.bf16 %v3413_v1  ;;  %v612_v18 = vsel %vm597_vm8, %v3409_v8, %v3410_v52  ;;  %2231 = vmatprep.subr.bf16.mxu0 %v1286_v26  ;;  %v2762_v20 = vpack.c.bf16 %v855_v39, %v257_v7 }
 0x144   : > { %v556_v24 = vpop.permute.xlu0 %555  ;;  %2232 = vmatpush1.bf16.msra.mxu0 %v1285_v30  ;;  %v2758_v62 = vpack.c.bf16 %v814_v59, %v3774_v4  ;;  %v4348_v26 = vstv %s233_s14 }
 0x145   : > { %2916 = vmatpush3.bf16.msra.mxu1 %v1287_v37  ;;  %v717_v51 = vsel %vm702_vm9, %v3414_v12, %v3415_v29  ;;  %2756 = vmatprep.subr.msk.bf16.mxu0 %vm3741_vm7, %v2755_v23  ;;  %v613_v22 = vsel %vm597_vm8, %v3410_v52, %v556_v24  ;;  %v645_v27 = vsel %vm597_vm8, %v556_v24, %v3409_v8 }
 0x146   : > { %v661_v48 = vpop.permute.xlu1 %660  ;;  %2917 = vmatprep.subr.bf16.mxu1 %v3466_v16  ;;  %v1280_v32 = vpack.c.bf16 %v717_v51, %v612_v18 }
 0x147   : > { %v718_v33 = vsel %vm702_vm9, %v3415_v29, %v661_v48  ;;  %v750_v28 = vsel %vm702_vm9, %v661_v48, %v3414_v12 }
 0x148   : > { %v3418_v14 = vpop.permute.xlu0 %3417  ;;  %v1281_v63 = vpack.c.bf16 %v718_v33, %v613_v22  ;;  %v1279_v13 = vpack.c.bf16 %v750_v28, %v645_v27  ;;  %2759 = vmatpush1.bf16.msk.msra.mxu0 %vm3741_vm7, %v2758_v62 }
 0x149   : > { %2918 = vmatpush3.bf16.msk.msra.mxu1 %vm3741_vm7, %v2762_v20  ;;  %v3420_v15 = vunpack.i.h.bf16 %v3418_v14  ;;  %v3419_v7 = vunpack.i.l.bf16 %v3418_v14  ;;  %2235 = vmatprep.subr.bf16.mxu0 %v1280_v32 }
 0x14a   : > { %v3423_v40 = vpop.permute.xlu1 %3422  ;;  %2919 = vmatprep.subr.bf16.mxu1 %v3466_v16 }
 0x14b   : > { %v3425_v4 = vunpack.i.h.bf16 %v3423_v40  ;;  %v3424_v41 = vunpack.i.l.bf16 %v3423_v40  ;;  %v402_v38 = vsel %vm387_vm10, %v3419_v7, %v3420_v15 }
 0x14c   : > { %v330_v35 = vpop.permute.xlu0 %329  ;;  %2236 = vmatpush1.bf16.msra.mxu0 %v1279_v13 }
 0x14d   : > { %2920 = vmatpush3.bf16.msra.mxu1 %v1281_v63  ;;  %v507_v53 = vsel %vm492_vm11, %v3424_v41, %v3425_v4  ;;  %v403_v5 = vsel %vm387_vm10, %v3420_v15, %v330_v35  ;;  %v435_v43 = vsel %vm387_vm10, %v330_v35, %v3419_v7 }
 0x14e   : > { %v451_v56 = vpop.permute.xlu1 %450  ;;  %v1277_v10 = vpack.c.bf16 %v507_v53, %v402_v38  ;;  %2921 = vmatprep.subr.bf16.mxu1 %v3466_v16 }
 0x14f   : > { %v508_v34 = vsel %vm492_vm11, %v3425_v4, %v451_v56  ;;  %v540_v3 = vsel %vm492_vm11, %v451_v56, %v3424_v41 }
 0x150   : > { %v1276_v57 = vpack.c.bf16 %v540_v3, %v435_v43  ;;  %v1278_v47 = vpack.c.bf16 %v508_v34, %v403_v5  ;;  %2237 = vmatprep.subr.bf16.mxu0 %v1277_v10 }
 0x152   : > { %2238 = vmatpush1.bf16.msra.mxu0 %v1276_v57  ;;  %2922 = vmatpush3.bf16.msra.mxu1 %v1278_v47 }
 0x155   : > { %2760 = vmatmul.mubr.msk.bf16.vlgmr.msra.gmra.mxu0 %vm1296_vm12, %v4238_v55  ;;  %2924 = vmatmul.mubr.msk.bf16.vlgmr.msra.gmra.mxu1 %vm1296_vm12, %v4238_v55 }
 0x15a   : > { %v4340_v54 = vpop.permute.xlu0 %1401 }
 0x15e   : > { %v4343_v44 = vpop.permute.xlu1 %1406 }
 0x16f   : > { %v4354_v22 = vpop.f32.mrf.mxu0 }
 0x170   : > { %v1386_v16 = vpop.f32.mrf.mxu1 }
 0x171   : > { %v1395_v9 = vmax.f32 %v1386_v16, 0.0  ;;  %v4357_v63 = vpop.f32.mrf.mxu0 }
 0x172   : > { %v2827_v36 = vpop.f32.mrf.mxu1 }
 0x173   : > { %v1411_v58 = vmul.f32 %v4340_v54, %v1395_v9  ;;  %v4359_v13 = vpop.f32.mrf.mxu0 }
 0x174   : > { %v1389_v0 = vpop.f32.mrf.mxu1 }
 0x175   : > { %v1398_v50 = vmax.f32 %v1389_v0, 0.0  ;;  %v4361_v41 = vpop.f32.mrf.mxu0 }
 0x176   : > { %v2828_v61 = vpop.f32.mrf.mxu1 }
 0x177   : > { %v1414_v60 = vmul.f32 %v4343_v44, %v1398_v50 }
 0x179   : > { %v1429_v49 = vadd.f32 %v1414_v60, %v1411_v58 }
 0x17b   : > { %v1430_v45 = vrot.slane %v1429_v49, 4 }
 0x17d   : > { %v1431_v11 = vadd.f32 %v1430_v45, %v1429_v49 }
 0x17f   : > { %v1432_v25 = vrot.slane %v1431_v11, 2 }
 0x181   : > { %v1433_v6 = vadd.f32 %v1432_v25, %v1431_v11 }
 0x183   : > { %v1434_v8 = vrot.slane %v1433_v6, 1 }
 0x184   : > { %v1526_v21 = vpop.f32.mrf.mxu1 }
 0x185   : > { %v1535_v2 = vmax.f32 %v1526_v21, 0.0  ;;  %v1435_v23 = vadd.f32 %v1434_v8, %v1433_v6  ;;  %v1483_v5 = vpop.f32.mrf.mxu0 }
 0x186   : > { %v2841_v55 = vpop.f32.mrf.mxu1 }
 0x187   : > { %v1541_v46 = vmul.f32 %v1535_v2, %v4340_v54  ;;  %v1439_v39 = vadd.f32 %v4348_v26, %v1435_v23  ;;  %v4366_v9 = vpop.f32.mrf.mxu0 }
 0x188   : > { %v1529_v31 = vpop.f32.mrf.mxu1 }
 0x189   : > { %v1538_v42 = vmax.f32 %v1529_v31, 0.0  ;;  %v1487_v50 = vpop.f32.mrf.mxu0 }
 0x18a   : > { %v2842_v19 = vpop.f32.mrf.mxu1 }
 0x18b   : > { %v1544_v37 = vmul.f32 %v1538_v42, %v4343_v44  ;;  %v1489_v60 = vpop.f32.mrf.mxu0 }
 0x18d   : > { %v1559_v52 = vadd.f32 %v1544_v37, %v1541_v46 }
 0x18f   : > { %v1560_v30 = vrot.slane %v1559_v52, 4 }
 0x191   : > { %v1561_v1 = vadd.f32 %v1560_v30, %v1559_v52 }
 0x193   : > { %v1562_v17 = vrot.slane %v1561_v1, 2 }
 0x195   : > { %v1563_v29 = vadd.f32 %v1562_v17, %v1561_v1 }
 0x197   : > { %v1564_v12 = vrot.slane %v1563_v29, 1 }
 0x199   : > { %v1565_v24 = vadd.f32 %v1564_v12, %v1563_v29 }
 0x19b   : > { %v1568_v18 = vadd.f32 %v1565_v24, %v4348_v26 }
 0x19d   : > { %v2346_v59 = vsel %vm2343_vm13, %v1439_v39, %v1568_v18 }
 0x19f   : > { %v1612_v45 = vpop.f32.mrf.mxu0 }
 0x1a0   : > { %v1655_v51 = vpop.f32.mrf.mxu1 }
 0x1a1   : > { %v1664_v48 = vmax.f32 %v1655_v51, 0.0  ;;  %v1614_v11 = vpop.f32.mrf.mxu0 }
 0x1a2   : > { %v2855_v20 = vpop.f32.mrf.mxu1 }
 0x1a3   : > { %v1670_v28 = vmul.f32 %v1664_v48, %v4340_v54  ;;  %v1616_v25 = vpop.f32.mrf.mxu0 }
 0x1a4   : > { %v1658_v33 = vpop.f32.mrf.mxu1 }
 0x1a5   : > { %v1667_v32 = vmax.f32 %v1658_v33, 0.0  ;;  %v1618_v37 = vpop.f32.mrf.mxu0 }
 0x1a6   : > { %v2856_v62 = vpop.f32.mrf.mxu1 }
 0x1a7   : > { %v1673_v14 = vmul.f32 %v1667_v32, %v4343_v44  ;;  %v1396_v32 = vmax.f32 %v4359_v13, 0.0  ;;  %v1533_v62 = vmax.f32 %v1483_v5, 0.0  ;;  %v1537_v5 = vmax.f32 %v1489_v60, 0.0 }
 0x1a9   : > { %v1688_v27 = vadd.f32 %v1673_v14, %v1670_v28  ;;  %v1393_v28 = vmax.f32 %v4354_v22, 0.0  ;;  %v1536_v14 = vmax.f32 %v1487_v50, 0.0  ;;  %v1412_v13 = vmul.f32 %v4343_v44, %v1396_v32 }
 0x1ab   : > { %v1689_v15 = vrot.slane %v1688_v27, 4  ;;  %v1409_v22 = vmul.f32 %v4340_v54, %v1393_v28 }
 0x1ad   : > { %v1690_v7 = vadd.f32 %v1689_v15, %v1688_v27 }
 0x1af   : > { %v1691_v40 = vrot.slane %v1690_v7, 2 }
 0x1b1   : > { %v1692_v4 = vadd.f32 %v1691_v40, %v1690_v7  ;;  %v1394_v40 = vmax.f32 %v4357_v63, 0.0 }
 0x1b3   : > { %v1693_v38 = vrot.slane %v1692_v4, 1  ;;  %v4371_v52 = vpop.f32.mrf.mxu0 }
 0x1b4   : > { %v1784_v35 = vpop.f32.mrf.mxu1 }
 0x1b5   : > { %v1694_v53 = vadd.f32 %v1693_v38, %v1692_v4  ;;  %v1793_v56 = vmax.f32 %v1784_v35, 0.0  ;;  %v4375_v29 = vpop.f32.mrf.mxu0  ;;  %v1397_v35 = vmax.f32 %v4361_v41, 0.0  ;;  %v1666_v41 = vmax.f32 %v1618_v37, 0.0 }
 0x1b6   : > { %v2869_v10 = vpop.f32.mrf.mxu1 }
 0x1b7   : > { %v1697_v43 = vadd.f32 %v1694_v53, %v4348_v26  ;;  %v1799_v57 = vmul.f32 %v1793_v56, %v4340_v54  ;;  %v4377_v24 = vpop.f32.mrf.mxu0  ;;  %v1534_v53 = vmax.f32 %v4366_v9, 0.0  ;;  %v1539_v56 = vmul.f32 %v1533_v62, %v4340_v54 }
 0x1b8   : > { %v1787_v34 = vpop.f32.mrf.mxu1  ;;  %v1542_v10 = vmul.f32 %v1536_v14, %v4343_v44  ;;  %v1415_v9 = vadd.f32 %v1412_v13, %v1409_v22  ;;  %v1413_v50 = vmul.f32 %v4343_v44, %v1397_v35 }
 0x1b9   : > { %v2350_v3 = vsel %vm2347_vm14, %v2346_v59, %v1697_v43  ;;  %v1796_v47 = vmax.f32 %v1787_v34, 0.0  ;;  %v4379_v51 = vpop.f32.mrf.mxu0  ;;  %v1662_v34 = vmax.f32 %v1612_v45, 0.0 }
 0x1ba   : > { %v2870_v16 = vpop.f32.mrf.mxu1 }
 0x1bb   : > { %v1802_v36 = vmul.f32 %v1796_v47, %v4343_v44  ;;  %v1668_v60 = vmul.f32 %v1662_v34, %v4340_v54 }
 0x1bd   : > { %v1817_v0 = vadd.f32 %v1802_v36, %v1799_v57  ;;  %v1665_v57 = vmax.f32 %v1616_v25, 0.0  ;;  %v1410_v36 = vmul.f32 %v4340_v54, %v1394_v40 }
 0x1bf   : > { %v1818_v58 = vrot.slane %v1817_v0, 4  ;;  %v1671_v45 = vmul.f32 %v1665_v57, %v4343_v44 }
 0x1c1   : > { %v1819_v61 = vadd.f32 %v1818_v58, %v1817_v0  ;;  %v1545_v0 = vadd.f32 %v1542_v10, %v1539_v56  ;;  %v1540_v58 = vmul.f32 %v1534_v53, %v4340_v54 }
 0x1c3   : > { %v1820_v49 = vrot.slane %v1819_v61, 2  ;;  %v1546_v25 = vrot.slane %v1545_v0, 4 }
 0x1c5   : > { %v1821_v21 = vadd.f32 %v1820_v49, %v1819_v61  ;;  %v1543_v61 = vmul.f32 %v1537_v5, %v4343_v44 }
 0x1c7   : > { %v1822_v2 = vrot.slane %v1821_v21, 1 }
 0x1c9   : > { %v1823_v55 = vadd.f32 %v1822_v2, %v1821_v21  ;;  %v1672_v21 = vmul.f32 %v1666_v41, %v4343_v44 }
 0x1cb   : > { %v1826_v31 = vadd.f32 %v1823_v55, %v4348_v26  ;;  %v1416_v55 = vrot.slane %v1415_v9, 4 }
 0x1cd   : > { %v2354_v42 = vsel %vm2351_vm15, %v2350_v3, %v1826_v31  ;;  %v1663_v3 = vmax.f32 %v1614_v11, 0.0  ;;  %v1422_v31 = vadd.f32 %v1413_v50, %v1410_v36 }
 0x1cf   : > { %v1913_v46 = vpop.f32.mrf.mxu1  ;;  %v4381_v20 = vpop.f32.mrf.mxu0  ;;  %v1669_v49 = vmul.f32 %v1663_v3, %v4340_v54 }
 0x1d0   : > { %v1922_v19 = vmax.f32 %v1913_v46, 0.0  ;;  %v1674_v46 = vadd.f32 %v1671_v45, %v1668_v60 }
 0x1d1   : > { %v2883_v6 = vpop.f32.mrf.mxu1  ;;  %v4387_v7 = vpop.f32.mrf.mxu0 }
 0x1d2   : > { %v1928_v8 = vmul.f32 %v1922_v19, %v4340_v54  ;;  %v1681_v19 = vadd.f32 %v1672_v21, %v1669_v49  ;;  %v1417_v6 = vadd.f32 %v1416_v55, %v1415_v9 }
 0x1d3   : > { %v1916_v30 = vpop.f32.mrf.mxu1  ;;  %v4402_v47 = vpop.f32.mrf.mxu0 }
 0x1d4   : > { %v1925_v1 = vmax.f32 %v1916_v30, 0.0  ;;  %v1423_v30 = vrot.slane %v1422_v31, 4  ;;  %v1923_v60 = vmax.f32 %v4402_v47, 0.0 }
 0x1d5   : > { %v2884_v17 = vpop.f32.mrf.mxu1  ;;  %v4412_v2 = vpop.f32.mrf.mxu0 }
 0x1d6   : > { %v1931_v23 = vmul.f32 %v1925_v1, %v4343_v44  ;;  %v1675_v17 = vrot.slane %v1674_v46, 4 }
 0x1d8   : > { %v1946_v12 = vadd.f32 %v1931_v23, %v1928_v8  ;;  %v1547_v8 = vadd.f32 %v1546_v25, %v1545_v0  ;;  %v1682_v23 = vrot.slane %v1681_v19, 4  ;;  %v1676_v32 = vadd.f32 %v1675_v17, %v1674_v46 }
 0x1d9   : > { %v1921_v46 = vmax.f32 %v4387_v7, 0.0  ;;  %v1929_v17 = vmul.f32 %v1923_v60, %v4343_v44 }
 0x1da   : > { %v1947_v39 = vrot.slane %v1946_v12, 4  ;;  %v1683_v62 = vadd.f32 %v1682_v23, %v1681_v19  ;;  %v1677_v22 = vrot.slane %v1676_v32, 2  ;;  %v1924_v19 = vmax.f32 %v4412_v2, 0.0 }
 0x1dc   : > { %v1948_v18 = vadd.f32 %v1947_v39, %v1946_v12  ;;  %v1791_v12 = vmax.f32 %v4371_v52, 0.0  ;;  %v1794_v39 = vmax.f32 %v4377_v24, 0.0  ;;  %v1684_v13 = vrot.slane %v1683_v62, 2 }
 0x1dd   : > { %v1678_v36 = vadd.f32 %v1677_v22, %v1676_v32 }
 0x1de   : > { %v1949_v59 = vrot.slane %v1948_v18, 2  ;;  %v1797_v14 = vmul.f32 %v1791_v12, %v4340_v54  ;;  %v1800_v40 = vmul.f32 %v1794_v39, %v4343_v44  ;;  %v1685_v0 = vadd.f32 %v1684_v13, %v1683_v62 }
 0x1df   : > { %v1927_v39 = vmul.f32 %v1921_v46, %v4340_v54 }
 0x1e0   : > { %v1950_v48 = vadd.f32 %v1949_v59, %v1948_v18  ;;  %v1418_v59 = vrot.slane %v1417_v6, 2  ;;  %v1803_v34 = vadd.f32 %v1800_v40, %v1797_v14  ;;  %v1679_v40 = vrot.slane %v1678_v36, 1 }
 0x1e2   : > { %v1951_v33 = vrot.slane %v1950_v48, 1  ;;  %v4424_v35 = vadd.f32 %v1418_v59, %v1417_v6  ;;  %v1804_v21 = vrot.slane %v1803_v34, 4  ;;  %v1680_v60 = vadd.f32 %v1679_v40, %v1678_v36 }
 0x1e3   : > { %v4414_v11 = vpop.f32.mrf.mxu0 }
 0x1e4   : > { %v1952_v27 = vadd.f32 %v1951_v33, %v1950_v48  ;;  %v4385_v15 = vpop.f32.mrf.mxu1  ;;  %v1424_v48 = vadd.f32 %v1423_v30, %v1422_v31  ;;  %v1548_v33 = vrot.slane %v1547_v8, 2  ;;  %v1420_v41 = vrot.slane %v4424_v35, 1 }
 0x1e5   : > { %v4416_v37 = vpop.f32.mrf.mxu0  ;;  %v2049_v49 = vmax.f32 %v4414_v11, 0.0  ;;  %v2051_v45 = vmax.f32 %v4385_v15, 0.0 }
 0x1e6   : > { %v1955_v4 = vadd.f32 %v1952_v27, %v4348_v26  ;;  %v2897_v38 = vpop.f32.mrf.mxu1  ;;  %v1792_v27 = vmax.f32 %v4375_v29, 0.0  ;;  %v1425_v52 = vrot.slane %v1424_v48, 2  ;;  %v1549_v24 = vadd.f32 %v1548_v33, %v1547_v8 }
 0x1e7   : > { %v2003_v18 = vpop.f32.mrf.mxu0  ;;  %v2050_v6 = vmax.f32 %v4416_v37, 0.0  ;;  %v2055_v23 = vmul.f32 %v2049_v49, %v4340_v54 }
 0x1e8   : > { %v4398_v43 = vsel %vm282_vm0, %v2354_v42, %v1955_v4  ;;  %v4400_v63 = vpop.f32.mrf.mxu1  ;;  %v1552_v42 = vadd.f32 %v1543_v61, %v1540_v58  ;;  %v1795_v4 = vmax.f32 %v4379_v51, 0.0  ;;  %v1798_v5 = vmul.f32 %v1792_v27, %v4340_v54 }
 0x1e9   : > { %v2005_v38 = vpop.f32.mrf.mxu0  ;;  %v1426_v51 = vadd.f32 %v1425_v52, %v1424_v48  ;;  %v1920_v61 = vmax.f32 %v4381_v20, 0.0  ;;  %v2052_v31 = vmax.f32 %v2003_v18, 0.0  ;;  %v2054_v25 = vmax.f32 %v4400_v63, 0.0 }
 0x1ea   : > { %v2898_v16 = vpop.f32.mrf.mxu1  ;;  %v1553_v1 = vrot.slane %v1552_v42, 4  ;;  %v1801_v3 = vmul.f32 %v1795_v4, %v4343_v44  ;;  %v2053_v30 = vmax.f32 %v2005_v38, 0.0  ;;  %v2057_v63 = vmul.f32 %v2051_v45, %v4340_v54 }
 0x1eb   : > { %v1550_v16 = vrot.slane %v1549_v24, 1  ;;  %v1926_v15 = vmul.f32 %v1920_v61, %v4340_v54  ;;  %v2058_v7 = vmul.f32 %v2052_v31, %v4343_v44  ;;  %v2060_v2 = vmul.f32 %v2054_v25, %v4343_v44 }
 0x1ec   : > { %v1554_v28 = vadd.f32 %v1553_v1, %v1552_v42  ;;  %v1810_v55 = vadd.f32 %v1801_v3, %v1798_v5  ;;  %v1930_v18 = vmul.f32 %v1924_v19, %v4343_v44  ;;  %v2056_v59 = vmul.f32 %v2050_v6, %v4340_v54 }
 0x1ed   : > { %v2059_v48 = vmul.f32 %v2053_v30, %v4343_v44  ;;  %v1427_v14 = vrot.slane %v1426_v51, 1  ;;  %v1932_v4 = vadd.f32 %v1929_v17, %v1926_v15  ;;  %v2061_v38 = vadd.f32 %v2058_v7, %v2055_v23 }
 0x1ee   : > { %v1555_v53 = vrot.slane %v1554_v28, 2  ;;  %v2075_v52 = vadd.f32 %v2060_v2, %v2057_v63  ;;  %v1551_v13 = vadd.f32 %v1550_v16, %v1549_v24  ;;  %v1811_v5 = vrot.slane %v1810_v55, 4 }
 0x1ef   : > { %v1939_v3 = vadd.f32 %v1930_v18, %v1927_v39  ;;  %v1933_v49 = vrot.slane %v1932_v4, 4  ;;  %v1428_v45 = vadd.f32 %v1427_v14, %v1426_v51  ;;  %v2062_v31 = vrot.slane %v2061_v38, 4 }
 0x1f0   : > { %v1556_v9 = vadd.f32 %v1555_v53, %v1554_v28  ;;  %v2076_v25 = vrot.slane %v2075_v52, 4  ;;  %v1566_v46 = vadd.f32 %v1551_v13, %v4348_v26  ;;  %v1812_v16 = vadd.f32 %v1811_v5, %v1810_v55 }
 0x1f1   : > { %v1438_v51 = vadd.f32 %v4348_v26, %v1428_v45  ;;  %v2063_v36 = vadd.f32 %v2062_v31, %v2061_v38 }
 0x1f2   : > { %v1557_v27 = vrot.slane %v1556_v9, 1 }
 0x1f3   : > { %v2064_v18 = vrot.slane %v2063_v36, 2 }
 0x1f4   : > { %v1558_v61 = vadd.f32 %v1557_v27, %v1556_v9  ;;  %v1934_v9 = vadd.f32 %v1933_v49, %v1932_v4 }
 0x1f6   : > { %v1935_v39 = vrot.slane %v1934_v9, 2 }
 0x1fd   : > { %v2128_v56 = vpop.f32.mrf.mxu0  ;;  %v2171_v10 = vpop.f32.mrf.mxu1 }
 0x1fe   : > { %v2178_v8 = vmax.f32 %v2128_v56, 0.0  ;;  %v2180_v47 = vmax.f32 %v2171_v10, 0.0  ;;  %v1686_v56 = vrot.slane %v1685_v0, 1  ;;  %v1805_v10 = vadd.f32 %v1804_v21, %v1803_v34 }
 0x1ff   : > { %v2130_v29 = vpop.f32.mrf.mxu0  ;;  %v2911_v57 = vpop.f32.mrf.mxu1  ;;  %v1940_v34 = vrot.slane %v1939_v3, 4 }
 0x200   : > { %v2179_v12 = vmax.f32 %v2130_v29, 0.0  ;;  %v2184_v33 = vmul.f32 %v2178_v8, %v4340_v54  ;;  %v2186_v28 = vmul.f32 %v2180_v47, %v4340_v54  ;;  %v2068_v29 = vadd.f32 %v2059_v48, %v2056_v59 }
 0x201   : > { %v2132_v50 = vpop.f32.mrf.mxu0  ;;  %v2174_v58 = vpop.f32.mrf.mxu1  ;;  %v1687_v19 = vadd.f32 %v1686_v56, %v1685_v0  ;;  %v1806_v24 = vrot.slane %v1805_v10, 2  ;;  %v2077_v8 = vadd.f32 %v2076_v25, %v2075_v52  ;;  %v1941_v15 = vadd.f32 %v1940_v34, %v1939_v3 }
 0x202   : > { %v2181_v1 = vmax.f32 %v2132_v50, 0.0  ;;  %v2183_v11 = vmax.f32 %v2174_v58, 0.0  ;;  %v2185_v53 = vmul.f32 %v2179_v12, %v4340_v54  ;;  %v1421_v58 = vadd.f32 %v1420_v41, %v4424_v35 }
 0x203   : > { %v2912_v42 = vpop.f32.mrf.mxu1  ;;  %v2134_v20 = vpop.f32.mrf.mxu0  ;;  %v2069_v21 = vrot.slane %v2068_v29, 4  ;;  %v1567_v35 = vadd.f32 %v1558_v61, %v4348_v26  ;;  %v1695_v41 = vadd.f32 %v1680_v60, %v4348_v26  ;;  %v1696_v55 = vadd.f32 %v1687_v19, %v4348_v26 }
 0x204   : > { %v2182_v37 = vmax.f32 %v2134_v20, 0.0  ;;  %v2187_v32 = vmul.f32 %v2181_v1, %v4343_v44  ;;  %v2189_v62 = vmul.f32 %v2183_v11, %v4343_v44  ;;  %v1437_v20 = vadd.f32 %v4348_v26, %v1421_v58 }
 0x205   : > { %v1807_v1 = vadd.f32 %v1806_v24, %v1805_v10  ;;  %v1813_v11 = vrot.slane %v1812_v16, 2  ;;  %v2070_v17 = vadd.f32 %v2069_v21, %v2068_v29  ;;  %v2345_v12 = vsel %vm2343_vm13, %v1438_v51, %v1567_v35 }
 0x206   : > { %v2188_v22 = vmul.f32 %v2182_v37, %v4343_v44  ;;  %v2190_v57 = vadd.f32 %v2187_v32, %v2184_v33  ;;  %v2204_v50 = vadd.f32 %v2189_v62, %v2186_v28  ;;  %v2344_v0 = vsel %vm2343_vm13, %v1437_v20, %v1566_v46 }
 0x207   : > { %v4463_v37 = vsel %vm2347_vm14, %v2344_v0, %v1695_v41  ;;  %v2078_v59 = vrot.slane %v2077_v8, 2  ;;  %v4466_v62 = vsel %vm2347_vm14, %v2345_v12, %v1696_v55  ;;  %v1808_v14 = vrot.slane %v1807_v1, 1 }
 0x208   : > { %v2197_v42 = vadd.f32 %v2188_v22, %v2185_v53  ;;  %v2191_v6 = vrot.slane %v2190_v57, 4  ;;  %v2205_v30 = vrot.slane %v2204_v50, 4  ;;  %v1814_v27 = vadd.f32 %v1813_v11, %v1812_v16 }
 0x209   : > { %v1942_v4 = vrot.slane %v1941_v15, 2  ;;  %v2071_v38 = vrot.slane %v2070_v17, 2  ;;  %v1936_v56 = vadd.f32 %v1935_v39, %v1934_v9  ;;  %v2065_v29 = vadd.f32 %v2064_v18, %v2063_v36 }
 0x20a   : > { %v2198_v47 = vrot.slane %v2197_v42, 4  ;;  %v2192_v23 = vadd.f32 %v2191_v6, %v2190_v57  ;;  %v2206_v63 = vadd.f32 %v2205_v30, %v2204_v50  ;;  %v2079_v57 = vadd.f32 %v2078_v59, %v2077_v8 }
 0x20b   : > { %v2072_v46 = vadd.f32 %v2071_v38, %v2070_v17  ;;  %v1815_v30 = vrot.slane %v1814_v27, 1  ;;  %v1937_v20 = vrot.slane %v1936_v56, 1  ;;  %v2066_v9 = vrot.slane %v2065_v29, 1 }
 0x20c   : > { %v2199_v48 = vadd.f32 %v2198_v47, %v2197_v42  ;;  %v2193_v52 = vrot.slane %v2192_v23, 2  ;;  %v2207_v53 = vrot.slane %v2206_v63, 2  ;;  %v1943_v42 = vadd.f32 %v1942_v4, %v1941_v15 }
 0x20d   : > { %v2080_v35 = vrot.slane %v2079_v57, 1  ;;  %v1809_v47 = vadd.f32 %v1808_v14, %v1807_v1  ;;  %v2073_v15 = vrot.slane %v2072_v46, 1  ;;  %v2067_v12 = vadd.f32 %v2066_v9, %v2065_v29 }
 0x20e   : > { %v2200_v50 = vrot.slane %v2199_v48, 2  ;;  %v2194_v19 = vadd.f32 %v2193_v52, %v2192_v23  ;;  %v2208_v24 = vadd.f32 %v2207_v53, %v2206_v63  ;;  %v1944_v0 = vrot.slane %v1943_v42, 1 }
 0x20f   : > { %v1816_v63 = vadd.f32 %v1815_v30, %v1814_v27 }
 0x210   : > { %v2201_v41 = vadd.f32 %v2200_v50, %v2199_v48  ;;  %v2195_v55 = vrot.slane %v2194_v19, 1  ;;  %v2209_v11 = vrot.slane %v2208_v24, 1  ;;  %v1824_v48 = vadd.f32 %v1809_v47, %v4348_v26 }
 0x211   : > { %v1945_v1 = vadd.f32 %v1944_v0, %v1943_v42  ;;  %v1825_v38 = vadd.f32 %v1816_v63, %v4348_v26 }
 0x215   : > { %v2257_v7 = vpop.f32.mrf.mxu0  ;;  %v2300_v2 = vpop.f32.mrf.mxu1 }
 0x216   : > { %v2307_v33 = vmax.f32 %v2257_v7, 0.0  ;;  %v2309_v40 = vmax.f32 %v2300_v2, 0.0  ;;  %v2081_v7 = vadd.f32 %v2080_v35, %v2079_v57  ;;  %v2202_v2 = vrot.slane %v2201_v41, 1 }
 0x217   : > { %v2259_v28 = vpop.f32.mrf.mxu0  ;;  %v2925_v32 = vpop.f32.mrf.mxu1 }
 0x218   : > { %v2308_v10 = vmax.f32 %v2259_v28, 0.0  ;;  %v2313_v58 = vmul.f32 %v2307_v33, %v4340_v54  ;;  %v2315_v49 = vmul.f32 %v2309_v40, %v4340_v54  ;;  %v2196_v33 = vadd.f32 %v2195_v55, %v2194_v19 }
 0x219   : > { %v2261_v22 = vpop.f32.mrf.mxu0  ;;  %v2303_v13 = vpop.f32.mrf.mxu1  ;;  %v2210_v28 = vadd.f32 %v2209_v11, %v2208_v24  ;;  %v2074_v32 = vadd.f32 %v2073_v15, %v2072_v46  ;;  %v2084_v52 = vadd.f32 %v2081_v7, %v4348_v26  ;;  %v2203_v53 = vadd.f32 %v2202_v2, %v2201_v41 }
 0x21a   : > { %v2310_v5 = vmax.f32 %v2261_v22, 0.0  ;;  %v2312_v3 = vmax.f32 %v2303_v13, 0.0  ;;  %v2314_v16 = vmul.f32 %v2308_v10, %v4340_v54  ;;  %v2082_v22 = vadd.f32 %v2067_v12, %v4348_v26 }
 0x21b   : > { %v2263_v61 = vpop.f32.mrf.mxu0  ;;  %v2926_v60 = vpop.f32.mrf.mxu1  ;;  %v2211_v29 = vadd.f32 %v2196_v33, %v4348_v26  ;;  %v2213_v57 = vadd.f32 %v2210_v28, %v4348_v26  ;;  %v2083_v50 = vadd.f32 %v2074_v32, %v4348_v26  ;;  %v2426_v11 = vlaneseq }
 0x21c   : > { %v2316_v45 = vmul.f32 %v2310_v5, %v4343_v44  ;;  %v2318_v31 = vmul.f32 %v2312_v3, %v4343_v44  ;;  %v2311_v25 = vmax.f32 %v2263_v61, 0.0  ;;  %v2352_v5 = vsel %vm2351_vm15, %v4463_v37, %v1824_v48 }
 0x21d   : > { %v1954_v3 = vadd.f32 %v1945_v1, %v4348_v26  ;;  %v2212_v37 = vadd.f32 %v2203_v53, %v4348_v26  ;;  %v2427_v7 = vshrl.u32 %v2426_v11, 7 }
 0x21e   : > { %v2319_v34 = vadd.f32 %v2316_v45, %v2313_v58  ;;  %v2333_v21 = vadd.f32 %v2318_v31, %v2315_v49  ;;  %v2317_v6 = vmul.f32 %v2311_v25, %v4343_v44  ;;  %v1938_v44 = vadd.f32 %v1937_v20, %v1936_v56 }
 0x21f   : > { %v2353_v49 = vsel %vm2351_vm15, %v4466_v62, %v1825_v38  ;;  %v2361_v31 = vsel %vm2358_vm1, %v4398_v43, %v2084_v52 }
 0x220   : > { %v2320_v51 = vrot.slane %v2319_v34, 4  ;;  %v2334_v36 = vrot.slane %v2333_v21, 4  ;;  %v2326_v8 = vadd.f32 %v2317_v6, %v2314_v16  ;;  %v1953_v27 = vadd.f32 %v1938_v44, %v4348_v26 }
 0x221   : > { %v2356_v24 = vsel %vm282_vm0, %v2353_v49, %v1954_v3  ;;  %v2365_v62 = vsel %vm2362_vm2, %v2361_v31, %v2213_v57 }
 0x222   : > { %v2321_v54 = vadd.f32 %v2320_v51, %v2319_v34  ;;  %v2335_v17 = vadd.f32 %v2334_v36, %v2333_v21  ;;  %v2327_v23 = vrot.slane %v2326_v8, 4  ;;  %v2355_v45 = vsel %vm282_vm0, %v2352_v5, %v1953_v27 }
 0x223   : > { %v2359_v25 = vsel %vm2358_vm1, %v2355_v45, %v2082_v22  ;;  %v2360_v34 = vsel %vm2358_vm1, %v2356_v24, %v2083_v50  ;;  %vm4503_vm0 = vcmp.lt.s32.totalorder %v2426_v11, 384 }
 0x224   : > { %v2322_v39 = vrot.slane %v2321_v54, 2  ;;  %v2336_v18 = vrot.slane %v2335_v17, 2  ;;  %v2328_v59 = vadd.f32 %v2327_v23, %v2326_v8  ;;  %v2363_v16 = vsel %vm2362_vm2, %v2359_v25, %v2211_v29 }
 0x225   : > { %v2364_v30 = vsel %vm2362_vm2, %v2360_v34, %v2212_v37  ;;  %v3474_v8 = vmov 1966171168  }
 0x226   : > { %v2323_v14 = vadd.f32 %v2322_v39, %v2321_v54  ;;  %v2337_v40 = vadd.f32 %v2336_v18, %v2335_v17  ;;  %v2329_v4 = vrot.slane %v2328_v59, 2  ;;  %v2424_v47 = vunpack.c.l.s4 %v3474_v8 }
 0x228   : > { %v2324_v13 = vrot.slane %v2323_v14, 1  ;;  %v2338_v56 = vrot.slane %v2337_v40, 1  ;;  %v2330_v10 = vadd.f32 %v2329_v4, %v2328_v59  ;;  %v2425_v63 = vunpack.c.0.s8 %v2424_v47 }
 0x22a   : > { %v2325_v58 = vadd.f32 %v2324_v13, %v2323_v14  ;;  %v2339_v61 = vadd.f32 %v2338_v56, %v2337_v40  ;;  %v2331_v60 = vrot.slane %v2330_v10, 1  ;;  %v2428_v1 = vsub.s32 %v2425_v63, %v2427_v7 }
 0x22c   : > { %v2340_v42 = vadd.f32 %v2325_v58, %v4348_v26  ;;  %v2342_v46 = vadd.f32 %v2339_v61, %v4348_v26  ;;  %v2332_v19 = vadd.f32 %v2331_v60, %v2330_v10 }
 0x22e   : > { %v2367_v21 = vsel %vm2366_vm3, %v2363_v16, %v2340_v42  ;;  %v2369_v43 = vsel %vm2366_vm3, %v2365_v62, %v2342_v46  ;;  %v2341_v6 = vadd.f32 %v2332_v19, %v4348_v26 }
 0x22f   : > { %v2370_v20 = vrot.slane %v2367_v21, 4  ;;  %v2382_v35 = vrot.slane %v2369_v43, 4 }
 0x230   : > { %v2368_v41 = vsel %vm2366_vm3, %v2364_v30, %v2341_v6 }
 0x231   : > { %v2371_v9 = vmax.f32 %v2367_v21, %v2370_v20  ;;  %v2383_v51 = vmax.f32 %v2369_v43, %v2382_v35  ;;  %v2376_v36 = vrot.slane %v2368_v41, 4 }
 0x233   : > { %v2372_v0 = vrot.slane %v2371_v9, 2  ;;  %v2384_v55 = vrot.slane %v2383_v51, 2  ;;  %v2377_v15 = vmax.f32 %v2368_v41, %v2376_v36 }
 0x235   : > { %v2373_v54 = vmax.f32 %v2371_v9, %v2372_v0  ;;  %v2385_v17 = vmax.f32 %v2383_v51, %v2384_v55  ;;  %v2378_v23 = vrot.slane %v2377_v15, 2 }
 0x237   : > { %v2374_v26 = vrot.slane %v2373_v54, 1  ;;  %v2386_v44 = vrot.slane %v2385_v17, 1  ;;  %v2379_v2 = vmax.f32 %v2377_v15, %v2378_v23 }
 0x239   : > { %v2375_v12 = vmax.f32 %v2373_v54, %v2374_v26  ;;  %v2387_v39 = vmax.f32 %v2385_v17, %v2386_v44  ;;  %v2380_v18 = vrot.slane %v2379_v2, 1 }
 0x23b   : > { %v2388_v59 = vsub.f32 %v2367_v21, %v2375_v12  ;;  %v2390_v48 = vsub.f32 %v2369_v43, %v2387_v39  ;;  %v2381_v33 = vmax.f32 %v2379_v2, %v2380_v18 }
 0x23d   : > { %v2391_v28 = vmul.f32 1.442695, %v2388_v59  ;;  %v2395_v32 = vmul.f32 1.442695, %v2390_v48  ;;  %v2389_v14 = vsub.f32 %v2368_v41, %v2381_v33 }
 0x23f   : > { %3429 = vpow2.f32 %v2391_v28  ;;  %v2393_v40 = vmul.f32 1.442695, %v2389_v14 }
 0x240   : > { %3431 = vpow2.f32 %v2395_v32 }
 0x241   : > { %3433 = vpow2.f32 %v2393_v40 }
 0x24c   : > { %v3430_v38 = vpop.eup %3429 }
 0x24d   : > { %v3432_v27 = vpop.eup %3431  ;;  %v2397_v52 = vrot.slane %v3430_v38, 4 }
 0x24e   : > { %v3434_v53 = vpop.eup %3433  ;;  %v2409_v22 = vrot.slane %v3432_v27, 4 }
 0x24f   : > { %v2398_v13 = vadd.f32 %v3430_v38, %v2397_v52  ;;  %v2403_v56 = vrot.slane %v3434_v53, 4 }
 0x250   : > { %v2410_v10 = vadd.f32 %v3432_v27, %v2409_v22 }
 0x251   : > { %v2399_v5 = vrot.slane %v2398_v13, 2  ;;  %v2404_v3 = vadd.f32 %v3434_v53, %v2403_v56 }
 0x252   : > { %v2411_v29 = vrot.slane %v2410_v10, 2 }
 0x253   : > { %v2400_v57 = vadd.f32 %v2399_v5, %v2398_v13  ;;  %v2405_v50 = vrot.slane %v2404_v3, 2 }
 0x254   : > { %v2412_v58 = vadd.f32 %v2411_v29, %v2410_v10 }
 0x255   : > { %v2401_v61 = vrot.slane %v2400_v57, 1  ;;  %v2406_v60 = vadd.f32 %v2405_v50, %v2404_v3 }
 0x256   : > { %v2413_v49 = vrot.slane %v2412_v58, 1 }
 0x257   : > { %v2407_v45 = vrot.slane %v2406_v60, 1  ;;  %v2402_v31 = vadd.f32 %v2401_v61, %v2400_v57 }
 0x258   : > { %v2414_v37 = vadd.f32 %v2413_v49, %v2412_v58 }
 0x259   : > { %v2408_v25 = vadd.f32 %v2407_v45, %v2406_v60 }
 0x25a   : > { %v2468_v46 = vrot.slane %v2414_v37, %v2428_v1 }
 0x25b   : > { %v2454_v42 = vcombine.low %v2402_v31, %v2408_v25 }
 0x25d   : > { %v2461_v19 = vrot.slane %v2454_v42, %v2428_v1 }
 0x25f   : > { %v2469_v24 = vcombine.low %v2461_v19, %v2468_v46 }
 0x261   : > { %v2476_v16 = vrot.slane %v2469_v24, %v2428_v1 }
 0x263   : > { %2478 = vst.msk [vmem:[#allocation3] sm:$0x7] %vm4503_vm0, %v2476_v16 }
 0x26a   : > { %v2582_v62 = vld [vmem:[#allocation3] sm:$0x7] }
 0x26b   : > { %3435 = vrcp.f32 %v2582_v62 }
 0x278   : > { %v3436_v34 = vpop.eup %3435 }
 0x279   : > { %v2584_v21 = vmul.f32 %v3436_v34, %v2582_v62 }
 0x27b   : > { %v2585_v43 = vsub.f32 2.0, %v2584_v21 }
 0x27d   : > { %v2586_v6 = vmul.f32 %v3436_v34, %v2585_v43 }
 0x27f   : > { %2591 = vst.msk [vmem:[%s227_s21] sm:$0x7] %vm4503_vm0, %v2586_v6 }
 0x280 PF: > { %s15_s19 = sadd.s32 1, %s3460_s19   ;;  %s4535_s17 = smov %s3456_s18 }
 0x281   : > { %p12_p5 = scmp.ge.s32.totalorder %s15_s19, 4   ;;  %s4536_s18 = smov %s4538_s3 }
 0x283   :  { %14 = sbr.rel (!%p12_p5) target bundleno = 2 (0x2), region = 78 }

</bundles_post_ra>
